<compile_context>
chip_gen: v5e
topology: v5e:2x2
jax: 0.10.0
libtpu: 0.0.40
codegen_flags: <defaults>
</compile_context>

<pallas_src>
import jax
import jax.numpy as jnp
from jax.experimental import pallas as pl
from jax.experimental.pallas import tpu as pltpu

BN_EPS = 1e-4


def _fc_bn_relu(x2d, w, gamma, beta, n_groups, batch):
    """(G*B, Din) @ (Din, Dout) -> per-group BatchNorm1d (batch stats, biased var) -> ReLU.

    The matmul is a single 2-D MXU op over all G instances; BN statistics are taken
    per instance by reshaping to (G, B, Dout) (layout-preserving for B % 8 == 0).
    """
    h = jnp.dot(x2d.astype(w.dtype), w, preferred_element_type=jnp.float32)  # (G*B, Dout)
    d_out = h.shape[-1]
    h3 = h.reshape(n_groups, batch, d_out)
    inv_b = jnp.float32(1.0 / batch)
    s1 = jnp.sum(h3, axis=1, keepdims=True)            # XLU reduce  -> (G, 1, Dout)
    s2 = jnp.sum(h3 * h3, axis=1, keepdims=True)       # XLU reduce (independent of s1)
    mean = s1 * inv_b
    var = jnp.maximum(s2 * inv_b - mean * mean, 0.0)    # biased var, clamp fp noise
    scale = gamma * jax.lax.rsqrt(var + BN_EPS)         # EUP; gamma (1, Dout) broadcasts
    shift = beta - mean * scale
    y = jnp.maximum(h3 * scale + shift, 0.0)            # single fused scale/shift/ReLU pass
    return y.reshape(n_groups * batch, d_out)


def gen_layer_kernel(x_ref, w1_ref, g1_ref, b1_ref,
                     w2_ref, g2_ref, b2_ref, w3_ref, o_ref):
    n_groups, batch, d_in = x_ref.shape

    # Hoist BN affine params once per invocation.
    g1 = g1_ref[...]
    b1 = b1_ref[...]
    g2 = g2_ref[...]
    b2 = b2_ref[...]

    x = x_ref[...].reshape(n_groups * batch, d_in)       # layout-preserving flatten
    h1 = _fc_bn_relu(x, w1_ref[...], g1, b1, n_groups, batch)
    h2 = _fc_bn_relu(h1, w2_ref[...], g2, b2, n_groups, batch)
    # Final (un-normalized) matmul kept in f32 — precision sensitive.
    out = jnp.dot(h2, w3_ref[...], preferred_element_type=jnp.float32)
    o_ref[...] = out.reshape(n_groups, batch, -1).astype(o_ref.dtype)


def generative_layer_simple_fc(x, params, *, use_bf16_matmul=False,
                               instances_per_block=None):
    """Forward pass.

    x: (N, B, D_in) = N independent module invocations (BN stats per instance),
       or (B, D_in) for a single invocation.
    params: (w1, g1, b1, w2, g2, b2, w3) with Linear weights pre-transposed to
            (in, out) and BN gamma/beta as (1, F) rows.
    use_bf16_matmul: store W1/W2 in bf16 and run the first two matmuls with bf16
            MXU operands + f32 accumulation (halves weight DMA; looser tolerance).
    instances_per_block: how many independent instances each grid step processes
            (default: enough to give the MXU ~128 LHS rows).
    """
    w1, g1, b1, w2, g2, b2, w3 = params

    squeeze = (x.ndim == 2)
    if squeeze:
        x = x[None]
    n_inst, batch, d_in = x.shape
    d_h1 = w1.shape[1]
    d_h2 = w2.shape[1]
    d_out = w3.shape[1]

    if use_bf16_matmul:
        w1 = w1.astype(jnp.bfloat16)
        w2 = w2.astype(jnp.bfloat16)
        # w3 stays f32: final matmul is the precision-sensitive one.

    # Group instances so each grid step feeds the MXU ~128 rows and amortizes the
    # per-step overhead; pad with zero-instances if needed (results are discarded).
    if instances_per_block is None:
        instances_per_block = max(1, min(n_inst, 128 // max(batch, 1)))
    g = int(instances_per_block)
    n_pad = (-n_inst) % g
    if n_pad:
        x = jnp.concatenate(
            [x, jnp.zeros((n_pad, batch, d_in), x.dtype)], axis=0)
    n_total = n_inst + n_pad

    # Weights / BN params: constant block index -> DMA'd once, VMEM-resident
    # across the whole grid.  Only x / out stream per grid step.
    def const2d(shape):
        return pl.BlockSpec(shape, lambda i: (0, 0))

    in_specs = [
        pl.BlockSpec((g, batch, d_in), lambda i: (i, 0, 0)),      # x  (streams)
        const2d((d_in, d_h1)),                                    # w1
        const2d((1, d_h1)),                                       # g1
        const2d((1, d_h1)),                                       # b1
        const2d((d_h1, d_h2)),                                    # w2
        const2d((1, d_h2)),                                       # g2
        const2d((1, d_h2)),                                       # b2
        const2d((d_h2, d_out)),                                   # w3
    ]
    out_specs = pl.BlockSpec((g, batch, d_out), lambda i: (i, 0, 0))

    out = pl.pallas_call(
        gen_layer_kernel,
        out_shape=jax.ShapeDtypeStruct((n_total, batch, d_out), jnp.float32),
        grid=(n_total // g,),
        in_specs=in_specs,
        out_specs=out_specs,
        compiler_params=pltpu.CompilerParams(
            # Instance-groups are fully independent -> shard across TCs on v7x;
            # plain sequential loop (no cost) on v5e/v6e.
            dimension_semantics=("parallel",),
        ),
    )(x, w1, g1, b1, w2, g2, b2, w3)

    out = out[:n_inst]
    return out[0] if squeeze else out


def _reference(x, params):
    """Pure-JAX reference (torch train-mode forward, per-instance batch stats)."""
    w1, g1, b1, w2, g2, b2, w3 = params

    def fc_bn_relu(h, w, gamma, beta):
        h = h @ w
        m = jnp.mean(h, axis=0, keepdims=True)
        v = jnp.mean((h - m) ** 2, axis=0, keepdims=True)
        return jnp.maximum((h - m) / jnp.sqrt(v + BN_EPS) * gamma + beta, 0.0)

    def one(xi):
        return fc_bn_relu(fc_bn_relu(xi, w1, g1, b1), w2, g2, b2) @ w3

    return one(x) if x.ndim == 2 else jax.vmap(one)(x)


if __name__ == "__main__":
    # config_1: num_inputs=128 -> num_outputs=128
    # config_2: num_inputs=128 -> num_outputs=128
    # config_3: num_outputs=128
    # N independent micro-batches amortize weight DMA / launch overhead; 16 instances
    # per grid step -> 128 MXU rows per matmul.
    N_INST, B, D_IN, D_H1, D_H2, D_OUT = 32, 8, 128, 128, 128, 128

    key = jax.random.PRNGKey(0)
    kx, k1, k2, k3, kg1, kb1, kg2, kb2 = jax.random.split(key, 8)

    x = jax.random.normal(kx, (N_INST, B, D_IN), dtype=jnp.float32)

    # Linear weights (already transposed to (in, out)); BN affine params as (1, F).
    w1 = jax.random.normal(k1, (D_IN, D_H1), dtype=jnp.float32) * 0.05
    w2 = jax.random.normal(k2, (D_H1, D_H2), dtype=jnp.float32) * 0.05
    w3 = jax.random.normal(k3, (D_H2, D_OUT), dtype=jnp.float32) * 0.05
    g1 = 1.0 + 0.1 * jax.random.normal(kg1, (1, D_H1), dtype=jnp.float32)
    b1 = 0.1 * jax.random.normal(kb1, (1, D_H1), dtype=jnp.float32)
    g2 = 1.0 + 0.1 * jax.random.normal(kg2, (1, D_H2), dtype=jnp.float32)
    b2 = 0.1 * jax.random.normal(kb2, (1, D_H2), dtype=jnp.float32)

    params = (w1, g1, b1, w2, g2, b2, w3)
    ref = _reference(x, params)

    # f32 path (default).
    out = generative_layer_simple_fc(x, params)
    out = jax.block_until_ready(out)
    assert out.shape == (N_INST, B, D_OUT)
    assert jnp.allclose(out, ref, atol=1e-4, rtol=1e-4), "f32 path mismatch vs reference"

    # Single-invocation (2-D) path still works (grid of one group of one instance).
    out_single = generative_layer_simple_fc(x[0], params)
    out_single = jax.block_until_ready(out_single)
    assert jnp.allclose(out_single, ref[0], atol=1e-4, rtol=1e-4), "2-D path mismatch"

    # Non-divisible instance count exercises the zero-padding path.
    out_odd = generative_layer_simple_fc(x[:5], params)
    out_odd = jax.block_until_ready(out_odd)
    assert jnp.allclose(out_odd, ref[:5], atol=1e-4, rtol=1e-4), "padded path mismatch"

    # bf16 MXU-operand path (layers 1-2 bf16-in/f32-acc, layer 3 f32): looser tolerance.
    out_bf16 = generative_layer_simple_fc(x, params, use_bf16_matmul=True)
    out_bf16 = jax.block_until_ready(out_bf16)
    assert jnp.allclose(out_bf16, ref, atol=5e-2, rtol=5e-2), "bf16 path mismatch"

    # TODO(synk): BatchNorm1d running_mean/running_var buffer updates are not modeled
    # (only the train-mode forward output is produced).

    print("KERNEL_OK")
</pallas_src>

<mosaic_0001>
module attributes {stable_mosaic.version = 11 : i64} {
  func.func @gen_layer_kernel(%arg0: i32, %arg1: memref<16x8x128xf32, #tpu.memory_space<vmem>>, %arg2: memref<128x128xf32, #tpu.memory_space<vmem>>, %arg3: memref<1x128xf32, #tpu.memory_space<vmem>>, %arg4: memref<1x128xf32, #tpu.memory_space<vmem>>, %arg5: memref<128x128xf32, #tpu.memory_space<vmem>>, %arg6: memref<1x128xf32, #tpu.memory_space<vmem>>, %arg7: memref<1x128xf32, #tpu.memory_space<vmem>>, %arg8: memref<128x128xf32, #tpu.memory_space<vmem>>, %arg9: memref<16x8x128xf32, #tpu.memory_space<vmem>>) attributes {dimension_semantics = [#tpu.dimension_semantics<parallel>], iteration_bounds = array<i64: 2>, scalar_prefetch = 0 : i64, scratch_operands = 0 : i64, tpu.core_type = #tpu.core_type<tc>, window_params = [{transform_indices = @transform_0, window_bounds = array<i64: 16, 8, 128>}, {pipeline_mode = #tpu.pipeline_mode<synchronous>, transform_indices = @transform_1, window_bounds = array<i64: 128, 128>}, {pipeline_mode = #tpu.pipeline_mode<synchronous>, transform_indices = @transform_2, window_bounds = array<i64: 1, 128>}, {pipeline_mode = #tpu.pipeline_mode<synchronous>, transform_indices = @transform_3, window_bounds = array<i64: 1, 128>}, {pipeline_mode = #tpu.pipeline_mode<synchronous>, transform_indices = @transform_4, window_bounds = array<i64: 128, 128>}, {pipeline_mode = #tpu.pipeline_mode<synchronous>, transform_indices = @transform_5, window_bounds = array<i64: 1, 128>}, {pipeline_mode = #tpu.pipeline_mode<synchronous>, transform_indices = @transform_6, window_bounds = array<i64: 1, 128>}, {pipeline_mode = #tpu.pipeline_mode<synchronous>, transform_indices = @transform_7, window_bounds = array<i64: 128, 128>}, {transform_indices = @transform_8, window_bounds = array<i64: 16, 8, 128>}]} {
    %c0 = arith.constant 0 : index
    %c0_0 = arith.constant 0 : index
    %0 = vector.load %arg3[%c0, %c0_0] : memref<1x128xf32, #tpu.memory_space<vmem>>, vector<1x128xf32>
    %c0_1 = arith.constant 0 : index
    %c0_2 = arith.constant 0 : index
    %1 = vector.load %arg4[%c0_1, %c0_2] : memref<1x128xf32, #tpu.memory_space<vmem>>, vector<1x128xf32>
    %c0_3 = arith.constant 0 : index
    %c0_4 = arith.constant 0 : index
    %2 = vector.load %arg6[%c0_3, %c0_4] : memref<1x128xf32, #tpu.memory_space<vmem>>, vector<1x128xf32>
    %c0_5 = arith.constant 0 : index
    %c0_6 = arith.constant 0 : index
    %3 = vector.load %arg7[%c0_5, %c0_6] : memref<1x128xf32, #tpu.memory_space<vmem>>, vector<1x128xf32>
    %c0_7 = arith.constant 0 : index
    %c0_8 = arith.constant 0 : index
    %c0_9 = arith.constant 0 : index
    %4 = vector.load %arg1[%c0_7, %c0_8, %c0_9] : memref<16x8x128xf32, #tpu.memory_space<vmem>>, vector<16x8x128xf32>
    %5 = vector.shape_cast %4 : vector<16x8x128xf32> to vector<128x128xf32>
    %c0_10 = arith.constant 0 : index
    %c0_11 = arith.constant 0 : index
    %6 = vector.load %arg2[%c0_10, %c0_11] : memref<128x128xf32, #tpu.memory_space<vmem>>, vector<128x128xf32>
    %cst = arith.constant dense<0.000000e+00> : vector<128x128xf32>
    %7 = tpu.matmul %5, %6, %cst {dimension_numbers = #tpu.dot_dimension_numbers<[1], [0], [0], [1], [0, 0, 1, 1], [], []>} : vector<128x128xf32>, vector<128x128xf32>, vector<128x128xf32> -> vector<128x128xf32>
    %8 = vector.shape_cast %7 : vector<128x128xf32> to vector<16x8x128xf32>
    %cst_12 = arith.constant dense<0.000000e+00> : vector<16x128xf32>
    %9 = vector.multi_reduction <add>, %8, %cst_12 [1] : vector<16x8x128xf32> to vector<16x128xf32>
    %10 = vector.shape_cast %9 : vector<16x128xf32> to vector<16x1x128xf32>
    %11 = arith.mulf %8, %8 : vector<16x8x128xf32>
    %cst_13 = arith.constant dense<0.000000e+00> : vector<16x128xf32>
    %12 = vector.multi_reduction <add>, %11, %cst_13 [1] : vector<16x8x128xf32> to vector<16x128xf32>
    %13 = vector.shape_cast %12 : vector<16x128xf32> to vector<16x1x128xf32>
    %cst_14 = arith.constant 1.250000e-01 : f32
    %14 = vector.broadcast %cst_14 : f32 to vector<16x1x128xf32>
    %15 = arith.mulf %10, %14 : vector<16x1x128xf32>
    %cst_15 = arith.constant 1.250000e-01 : f32
    %16 = vector.broadcast %cst_15 : f32 to vector<16x1x128xf32>
    %17 = arith.mulf %13, %16 : vector<16x1x128xf32>
    %18 = arith.mulf %15, %15 : vector<16x1x128xf32>
    %19 = arith.subf %17, %18 : vector<16x1x128xf32>
    %cst_16 = arith.constant 0.000000e+00 : f32
    %20 = vector.broadcast %cst_16 : f32 to vector<16x1x128xf32>
    %21 = arith.maximumf %19, %20 : vector<16x1x128xf32>
    %cst_17 = arith.constant 9.99999974E-5 : f32
    %22 = vector.broadcast %cst_17 : f32 to vector<16x1x128xf32>
    %23 = arith.addf %21, %22 : vector<16x1x128xf32>
    %24 = math.rsqrt %23 : vector<16x1x128xf32>
    %25 = vector.shape_cast %0 : vector<1x128xf32> to vector<1x1x128xf32>
    %26 = vector.broadcast %25 : vector<1x1x128xf32> to vector<16x1x128xf32>
    %27 = arith.mulf %26, %24 : vector<16x1x128xf32>
    %28 = arith.mulf %15, %27 : vector<16x1x128xf32>
    %29 = vector.shape_cast %1 : vector<1x128xf32> to vector<1x1x128xf32>
    %30 = vector.broadcast %29 : vector<1x1x128xf32> to vector<16x1x128xf32>
    %31 = arith.subf %30, %28 : vector<16x1x128xf32>
    %32 = vector.broadcast %27 : vector<16x1x128xf32> to vector<16x8x128xf32>
    %33 = arith.mulf %8, %32 : vector<16x8x128xf32>
    %34 = vector.broadcast %31 : vector<16x1x128xf32> to vector<16x8x128xf32>
    %35 = arith.addf %33, %34 : vector<16x8x128xf32>
    %cst_18 = arith.constant 0.000000e+00 : f32
    %36 = vector.broadcast %cst_18 : f32 to vector<16x8x128xf32>
    %37 = arith.maximumf %35, %36 : vector<16x8x128xf32>
    %38 = vector.shape_cast %37 : vector<16x8x128xf32> to vector<128x128xf32>
    %c0_19 = arith.constant 0 : index
    %c0_20 = arith.constant 0 : index
    %39 = vector.load %arg5[%c0_19, %c0_20] : memref<128x128xf32, #tpu.memory_space<vmem>>, vector<128x128xf32>
    %cst_21 = arith.constant dense<0.000000e+00> : vector<128x128xf32>
    %40 = tpu.matmul %38, %39, %cst_21 {dimension_numbers = #tpu.dot_dimension_numbers<[1], [0], [0], [1], [0, 0, 1, 1], [], []>} : vector<128x128xf32>, vector<128x128xf32>, vector<128x128xf32> -> vector<128x128xf32>
    %41 = vector.shape_cast %40 : vector<128x128xf32> to vector<16x8x128xf32>
    %cst_22 = arith.constant dense<0.000000e+00> : vector<16x128xf32>
    %42 = vector.multi_reduction <add>, %41, %cst_22 [1] : vector<16x8x128xf32> to vector<16x128xf32>
    %43 = vector.shape_cast %42 : vector<16x128xf32> to vector<16x1x128xf32>
    %44 = arith.mulf %41, %41 : vector<16x8x128xf32>
    %cst_23 = arith.constant dense<0.000000e+00> : vector<16x128xf32>
    %45 = vector.multi_reduction <add>, %44, %cst_23 [1] : vector<16x8x128xf32> to vector<16x128xf32>
    %46 = vector.shape_cast %45 : vector<16x128xf32> to vector<16x1x128xf32>
    %cst_24 = arith.constant 1.250000e-01 : f32
    %47 = vector.broadcast %cst_24 : f32 to vector<16x1x128xf32>
    %48 = arith.mulf %43, %47 : vector<16x1x128xf32>
    %cst_25 = arith.constant 1.250000e-01 : f32
    %49 = vector.broadcast %cst_25 : f32 to vector<16x1x128xf32>
    %50 = arith.mulf %46, %49 : vector<16x1x128xf32>
    %51 = arith.mulf %48, %48 : vector<16x1x128xf32>
    %52 = arith.subf %50, %51 : vector<16x1x128xf32>
    %cst_26 = arith.constant 0.000000e+00 : f32
    %53 = vector.broadcast %cst_26 : f32 to vector<16x1x128xf32>
    %54 = arith.maximumf %52, %53 : vector<16x1x128xf32>
    %cst_27 = arith.constant 9.99999974E-5 : f32
    %55 = vector.broadcast %cst_27 : f32 to vector<16x1x128xf32>
    %56 = arith.addf %54, %55 : vector<16x1x128xf32>
    %57 = math.rsqrt %56 : vector<16x1x128xf32>
    %58 = vector.shape_cast %2 : vector<1x128xf32> to vector<1x1x128xf32>
    %59 = vector.broadcast %58 : vector<1x1x128xf32> to vector<16x1x128xf32>
    %60 = arith.mulf %59, %57 : vector<16x1x128xf32>
    %61 = arith.mulf %48, %60 : vector<16x1x128xf32>
    %62 = vector.shape_cast %3 : vector<1x128xf32> to vector<1x1x128xf32>
    %63 = vector.broadcast %62 : vector<1x1x128xf32> to vector<16x1x128xf32>
    %64 = arith.subf %63, %61 : vector<16x1x128xf32>
    %65 = vector.broadcast %60 : vector<16x1x128xf32> to vector<16x8x128xf32>
    %66 = arith.mulf %41, %65 : vector<16x8x128xf32>
    %67 = vector.broadcast %64 : vector<16x1x128xf32> to vector<16x8x128xf32>
    %68 = arith.addf %66, %67 : vector<16x8x128xf32>
    %cst_28 = arith.constant 0.000000e+00 : f32
    %69 = vector.broadcast %cst_28 : f32 to vector<16x8x128xf32>
    %70 = arith.maximumf %68, %69 : vector<16x8x128xf32>
    %71 = vector.shape_cast %70 : vector<16x8x128xf32> to vector<128x128xf32>
    %c0_29 = arith.constant 0 : index
    %c0_30 = arith.constant 0 : index
    %72 = vector.load %arg8[%c0_29, %c0_30] : memref<128x128xf32, #tpu.memory_space<vmem>>, vector<128x128xf32>
    %cst_31 = arith.constant dense<0.000000e+00> : vector<128x128xf32>
    %73 = tpu.matmul %71, %72, %cst_31 {dimension_numbers = #tpu.dot_dimension_numbers<[1], [0], [0], [1], [0, 0, 1, 1], [], []>} : vector<128x128xf32>, vector<128x128xf32>, vector<128x128xf32> -> vector<128x128xf32>
    %74 = vector.shape_cast %73 : vector<128x128xf32> to vector<16x8x128xf32>
    %c0_32 = arith.constant 0 : index
    %c0_33 = arith.constant 0 : index
    %c0_34 = arith.constant 0 : index
    %75 = vector.load %arg9[%c0_32, %c0_33, %c0_34] : memref<16x8x128xf32, #tpu.memory_space<vmem>>, vector<16x8x128xf32>
    tpu.vector_store %arg9[%c0_32, %c0_33, %c0_34], %74 {strides = array<i32>} : memref<16x8x128xf32, #tpu.memory_space<vmem>>, vector<16x8x128xf32>,
    return
  }
  func.func @transform_0(%arg0: i32) -> (i32, i32, i32) {
    %c0_i32 = arith.constant 0 : i32
    %c0_i32_0 = arith.constant 0 : i32
    %c0_i32_1 = arith.constant 0 : i32
    return %arg0, %c0_i32, %c0_i32_0 : i32, i32, i32
  }
  func.func @transform_1(%arg0: i32) -> (i32, i32) {
    %c0_i32 = arith.constant 0 : i32
    %c0_i32_0 = arith.constant 0 : i32
    %c0_i32_1 = arith.constant 0 : i32
    return %c0_i32, %c0_i32_0 : i32, i32
  }
  func.func @transform_2(%arg0: i32) -> (i32, i32) {
    %c0_i32 = arith.constant 0 : i32
    %c0_i32_0 = arith.constant 0 : i32
    %c0_i32_1 = arith.constant 0 : i32
    return %c0_i32, %c0_i32_0 : i32, i32
  }
  func.func @transform_3(%arg0: i32) -> (i32, i32) {
    %c0_i32 = arith.constant 0 : i32
    %c0_i32_0 = arith.constant 0 : i32
    %c0_i32_1 = arith.constant 0 : i32
    return %c0_i32, %c0_i32_0 : i32, i32
  }
  func.func @transform_4(%arg0: i32) -> (i32, i32) {
    %c0_i32 = arith.constant 0 : i32
    %c0_i32_0 = arith.constant 0 : i32
    %c0_i32_1 = arith.constant 0 : i32
    return %c0_i32, %c0_i32_0 : i32, i32
  }
  func.func @transform_5(%arg0: i32) -> (i32, i32) {
    %c0_i32 = arith.constant 0 : i32
    %c0_i32_0 = arith.constant 0 : i32
    %c0_i32_1 = arith.constant 0 : i32
    return %c0_i32, %c0_i32_0 : i32, i32
  }
  func.func @transform_6(%arg0: i32) -> (i32, i32) {
    %c0_i32 = arith.constant 0 : i32
    %c0_i32_0 = arith.constant 0 : i32
    %c0_i32_1 = arith.constant 0 : i32
    return %c0_i32, %c0_i32_0 : i32, i32
  }
  func.func @transform_7(%arg0: i32) -> (i32, i32) {
    %c0_i32 = arith.constant 0 : i32
    %c0_i32_0 = arith.constant 0 : i32
    %c0_i32_1 = arith.constant 0 : i32
    return %c0_i32, %c0_i32_0 : i32, i32
  }
  func.func @transform_8(%arg0: i32) -> (i32, i32, i32) {
    %c0_i32 = arith.constant 0 : i32
    %c0_i32_0 = arith.constant 0 : i32
    %c0_i32_1 = arith.constant 0 : i32
    return %arg0, %c0_i32, %c0_i32_0 : i32, i32, i32
  }
}

</mosaic_0001>

<bundles_post_ra>
// kernel: tpu_custom_call.1
= control target key start
LH: loop header
LB: loop body
LE: loop exit
PB: predicated region body
PF: predicated region fallthrough
CT: control target
= control target key end

     0   :  { %s3644_s0 = inlined_call_operand.hbm [shape: f32[32,8,128], index: 0, kind: input, shape index: {}]   ;;  %s3645_s1 = inlined_call_operand.hbm [shape: f32[128,128], index: 1, kind: input, shape index: {}]   ;;  %s3646_s2 = inlined_call_operand.vmem [shape: f32[1,128], index: 2, kind: input, shape index: {}]   ;;  %s3647_s3 = inlined_call_operand.vmem [shape: f32[1,128], index: 3, kind: input, shape index: {}]   ;;  %s3648_s4 = inlined_call_operand.hbm [shape: f32[128,128], index: 4, kind: input, shape index: {}]   ;;  %s3649_s5 = inlined_call_operand.vmem [shape: f32[1,128], index: 5, kind: input, shape index: {}]   ;;  %s3650_s6 = inlined_call_operand.vmem [shape: f32[1,128], index: 6, kind: input, shape index: {}]   ;;  %s3651_s7 = inlined_call_operand.hbm [shape: f32[128,128], index: 7, kind: input, shape index: {}]   ;;  %s3652_s8 = inlined_call_operand.hbm [shape: f32[32,8,128], index: 8, kind: output, shape index: {}]  }
   0x1   :  { %3655 = sst [smem:[#allocation15_spill]] %s3645_s1 }
   0x2   :  { %3656 = sst [smem:[#allocation16_spill]] %s3648_s4 }
   0x3   :  { %13 = vsyncpa [#allocation3], 0 }
   0x4   :  { %15 = vsyncpa [#allocation3 + $0x1], 0 }
   0x5   :  { %16 = vsyncpa [#allocation6], 0 }
   0x6   :  { %17 = vsyncpa [#allocation9], 0 }
   0x7   :  { %18 = vsyncpa [#allocation4], 0 }
   0x8   :  { %20 = vsyncpa [#allocation4 + $0x1], 0  ;;  %s2552_s27 = smov 0   ;;  %s2554_s28 = smov 0  }
   0x9   :  { %s2556_s29 = smov 0   ;;  %s2558_s30 = smov 0  }
   0xa LB: > { %s2573_s9 = sadd.s32 4294967295, %s2498_s30   ;;  %s2087_s10 = sadd.s32 4294967294, %s2498_s30   ;;  %s2498_s30 = sphi %s2558_s30, %s3679_s30   ;;  %s2494_s29 = sphi %s2556_s29, %s3678_s29   ;;  %s2490_s28 = sphi %s2554_s28, %s3677_s28   ;;  %s2486_s27 = sphi %s2552_s27, %s3676_s27  }
   0xb   : > { %p46_p0 = scmp.ne.s32.totalorder %s2490_s28, %s2486_s27  ;;  %p47_p1 = scmp.eq.s32.totalorder %s2573_s9, 0 }
   0xc   : > { %p217_p2 = scmp.eq.s32.totalorder %s2573_s9, 1  ;;  %p223_p3 = scmp.eq.s32.totalorder %s2087_s10, 1 }
   0xd   : > { %p2582_p4 = por %p47_p1, %p46_p0  ;;  %p2088_p5 = scmp.ge.s32.totalorder %s2498_s30, 1 }
   0xe   : > { %p2587_p6 = por %p223_p3, %p46_p0  ;;  %p230_p7 = scmp.lt.s32.totalorder %s2498_s30, 3 }
   0xf   : > { %s3659_s1 = sld [smem:[#allocation15_spill]]  ;;  %s2500_s17 = smov [#allocation5]  }
  0x10   : > { %p2595_p8 = pnand %p2088_p5, %p230_p7  ;;  %s243_s18 = sshll.u32 %s2500_s17, 4  ;;  %s244_s18 = int_to_ptr.vmem [resolvable:$true] %s243_s18 }
  0x11   : > { %s3662_s4 = sld [smem:[#allocation16_spill]]  ;;  %s3653_s23 = smov 128  }
  0x12   : > { %p2173_p9 = pneg %p2595_p8  ;;  %s3654_s24 = smov 8  }
  0x13   : > { %s2503_s25 = smov [#allocation7]   ;;  %s281_s14 = sshll.u32 %s3651_s7, 4  ;;  %s282_s14 = int_to_ptr.hbm [resolvable:$true] %s281_s14 }
  0x14   : > { %p2603_p10 = pnand %p2173_p9, %p47_p1  ;;  %s263_s26 = sshll.u32 %s2503_s25, 4  ;;  %s264_s26 = int_to_ptr.vmem [resolvable:$true] %s263_s26 }
  0x15   : > { %s241_s15 = sshll.u32 %s3659_s1, 4  ;;  %s33_s21 = sadd.s32 1, %s2494_s29  ;;  %s242_s15 = int_to_ptr.hbm [resolvable:$true] %s241_s15 }
  0x16   : > { %2176 = dma.hbm_to_vmem [thread:$0]  (!%p2603_p10), %s242_s15, 2048, %s244_s18, [#allocation6], %s3653_s23, %s3653_s23, %s3654_s24  }
  0x17   : > { %s261_s22 = sshll.u32 %s3662_s4, 4  ;;  %s2504_s15 = smov [#allocation8]   ;;  %s262_s22 = int_to_ptr.hbm [resolvable:$true] %s261_s22 }
  0x18   : > { %2179 = dma.hbm_to_vmem [thread:$0]  (!%p2603_p10), %s262_s22, 2048, %s264_s26, [#allocation6], %s3653_s23, %s3653_s23, %s3654_s24  }
  0x19   : > { %s283_s17 = sshll.u32 %s2504_s15, 4  ;;  %s2625_s18 = sadd.s32 1, %s2498_s30   ;;  %s284_s17 = int_to_ptr.vmem [resolvable:$true] %s283_s17 }
  0x1a   : > { %2182 = dma.hbm_to_vmem [thread:$0]  (!%p2603_p10), %s282_s14, 2048, %s284_s17, [#allocation9], %s3653_s23, %s3653_s23, %s3654_s24  }
  0x1b   : > { %s30_s20 = ssub.s32 %s2498_s30, %s2625_s18  ;;  %p40_p13 = scmp.ne.s32.totalorder %s2494_s29, %s2490_s28 }
  0x1c   : > { %p31_p12 = scmp.eq.s32.totalorder %s30_s20, 0  ;;  %p41_p0 = scmp.eq.s32.totalorder %s2498_s30, 0 }
  0x1d   : > { %p2643_p3 = por %p217_p2, %p40_p13  ;;  %p2194_p5 = scmp.lt.s32.totalorder %s2498_s30, 2 }
  0x1e   : > { %s2639_s25 = scalar_select %p31_p12, %s2494_s29, %s33_s21  }
  0x1f   : > { %s297_s26 = sand.u32 1, %s2494_s29   ;;  %s2107_s19 = sshll.u32 %s2498_s30, 7 }
  0x20   : > { %p42_p7 = por %p41_p0, %p40_p13  ;;  %s2093_s10 = sshll.u32 %s297_s26, 7 }
  0x21   : > { %s306_s14 = scalar_lea.hbm %s3644_s0, %s2107_s19  ;;  %s301_s20 = scalar_lea.vmem [#allocation2], %s2093_s10 }
  0x22   : > { %s307_s17 = sshll.u32 %s306_s14, 4  ;;  %s309_s23 = sshll.u32 %s301_s20, 4  ;;  %s308_s17 = int_to_ptr.hbm [resolvable:$true] %s307_s17  ;;  %s310_s23 = int_to_ptr.vmem [resolvable:$true] %s309_s23 }
  0x23   : > { %p2653_p9 = pnand %p2194_p5, %p42_p7  ;;  %s298_s24 = scalar_lea.sflag [#allocation3], %s297_s26 }
  0x24   : > { %s2394_s1 = sshra.s32 %s308_s17, 4  ;;  %s2401_s10 = scalar_lea.hbm %s3644_s0, 256  ;;  %s2395_s1 = int_to_ptr.hbm [resolvable:$true] %s2394_s1 }
  0x25   : > { %s2396_s4 = scalar_lea.hbm %s2395_s1, 128  ;;  %p2398_p10 = pneg %p2653_p9 }
  0x26   : > { %p2397_p2 = scmp.ne.s32.totalorder %s2395_s1, %s2396_s4  ;;  %p2402_p0 = scmp.lt.s32.totalorder %s2395_s1, %s3644_s0 }
  0x27   : > { %p2403_p5 = scmp.lt.s32.totalorder %s2401_s10, %s2396_s4 }
  0x28   : > { %p2399_p12 = pnand %p2398_p10, %p2397_p2 }
  0x29   : > { %p2404_p7 = por %p2403_p5, %p2402_p0 }
  0x2a   : > { %p2400_p13 = pneg %p2399_p12 }
  0x2c   : > { %p2405_p11 = pnand %p2404_p7, %p2400_p13 }
  0x2e   : > { %2408 = shalt.err (!%p2405_p11)
}
  0x2f   : > { %s3665_s26 = smov 8   ;;  %s3666_s20 = smov 128  }
  0x30   : > { %2186 = dma.hbm_to_vmem [thread:$0]  (!%p2653_p9), %s308_s17, 2048, %s310_s23, %s298_s24, %s3666_s20, %s3666_s20, %s3665_s26  }
  0x31   : > { %321 = sbr.rel (%p2595_p8) target bundleno = 735 (0x2df), region = 52  ;;  %s2673_s19 = sand.u32 (!%p2595_p8), 1, %s2490_s28  }
  0x32   : > { %s2097_s1 = sshll.u32 (!%p2595_p8), %s2673_s19, 7  ;;  %s324_s4 = scalar_lea.sflag (!%p2595_p8), [#allocation3], %s2673_s19 }
  0x33   : > { %s2679_s13 = scalar_lea.vmem (!%p2595_p8), [#allocation2], %s2097_s1 }
  0x36   : > { %2469 = dma.done.wait (%p2582_p4), %s324_s4, 2048  }
  0x37   : > { %2471 = vsyncadd (%p2582_p4), %s324_s4, 4294965248 }
  0x38   : > { %2473 = dma.done.wait (%p47_p1), [#allocation6], 4096  }
  0x39   : > { %2475 = vsyncadd (%p47_p1), [#allocation6], 4294963200 }
  0x3a   : > { %2477 = dma.done.wait (%p47_p1), [#allocation9], 2048  }
  0x3b   : > { %2479 = vsyncadd (%p47_p1), [#allocation9], 4294965248  ;;  %v413_v0 = vld [vmem:[#allocation5 + $0x78] sm:$0xff]  ;;  %v412_v1 = vld [vmem:[#allocation5 + $0x70] sm:$0xff]  ;;  %s1970_s21 = scalar_lea.sflag [#allocation4], %s2673_s19  ;;  %s2444_s26 = scalar_lea.hbm %s3652_s8, 256 }
  0x3c   : > { %414 = vmatpush.msra.mxu0 %v413_v0  ;;  %2109 = vmatpush.msra.mxu3 %v413_v0  ;;  %v411_v2 = vld [vmem:[#allocation5 + $0x68] sm:$0xff]  ;;  %v410_v3 = vld [vmem:[#allocation5 + $0x60] sm:$0xff]  ;;  %v409_v4 = vld [vmem:[#allocation5 + $0x58] sm:$0xff] }
  0x3d   : > { %v408_v5 = vld [vmem:[#allocation5 + $0x50] sm:$0xff]  ;;  %v407_v6 = vld [vmem:[#allocation5 + $0x48] sm:$0xff]  ;;  %v406_v7 = vld [vmem:[#allocation5 + $0x40] sm:$0xff] }
  0x3e   : > { %415 = vmatpush.msra.mxu0 %v412_v1  ;;  %2110 = vmatpush.msra.mxu3 %v412_v1  ;;  %v405_v8 = vld [vmem:[#allocation5 + $0x38] sm:$0xff]  ;;  %v404_v9 = vld [vmem:[#allocation5 + $0x30] sm:$0xff]  ;;  %v403_v10 = vld [vmem:[#allocation5 + $0x28] sm:$0xff] }
  0x3f   : > { %v402_v11 = vld [vmem:[#allocation5 + $0x20] sm:$0xff]  ;;  %v401_v12 = vld [vmem:[#allocation5 + $0x18] sm:$0xff]  ;;  %v400_v13 = vld [vmem:[#allocation5 + $0x10] sm:$0xff] }
  0x40   : > { %416 = vmatpush.msra.mxu0 %v411_v2  ;;  %2111 = vmatpush.msra.mxu3 %v411_v2  ;;  %v399_v14 = vld [vmem:[#allocation5 + $0x8] sm:$0xff]  ;;  %v398_v15 = vld [vmem:[#allocation5] sm:$0xff]  ;;  %v384_v20 = vld [vmem:[%s2679_s13 + $0x10] sm:$0xff] }
  0x41   : > { %v382_v16 = vld [vmem:[%s2679_s13] sm:$0xff]  ;;  %v383_v18 = vld [vmem:[%s2679_s13 + $0x8] sm:$0xff]  ;;  %v396_v21 = vld [vmem:[%s2679_s13 + $0x70] sm:$0xff] }
  0x42   : > { %417 = vmatpush.msra.mxu0 %v410_v3  ;;  %2112 = vmatpush.msra.mxu3 %v410_v3  ;;  %v394_v17 = vld [vmem:[%s2679_s13 + $0x60] sm:$0xff]  ;;  %v395_v19 = vld [vmem:[%s2679_s13 + $0x68] sm:$0xff]  ;;  %v385_v22 = vld [vmem:[%s2679_s13 + $0x18] sm:$0xff] }
  0x43   : > { %v397_v23 = vld [vmem:[%s2679_s13 + $0x78] sm:$0xff]  ;;  %v386_v24 = vld [vmem:[%s2679_s13 + $0x20] sm:$0xff]  ;;  %v387_v25 = vld [vmem:[%s2679_s13 + $0x28] sm:$0xff] }
  0x44   : > { %418 = vmatpush.msra.mxu0 %v409_v4  ;;  %2113 = vmatpush.msra.mxu3 %v409_v4  ;;  %v388_v26 = vld [vmem:[%s2679_s13 + $0x30] sm:$0xff]  ;;  %v389_v27 = vld [vmem:[%s2679_s13 + $0x38] sm:$0xff]  ;;  %v390_v28 = vld [vmem:[%s2679_s13 + $0x40] sm:$0xff] }
  0x45   : > { %v391_v29 = vld [vmem:[%s2679_s13 + $0x48] sm:$0xff]  ;;  %v392_v30 = vld [vmem:[%s2679_s13 + $0x50] sm:$0xff]  ;;  %v393_v31 = vld [vmem:[%s2679_s13 + $0x58] sm:$0xff]  ;;  %s3592_s13 = scalar_lea.vmem [#allocation10], %s2097_s1  ;;  %s2108_s1 = sshll.u32 %s2573_s9, 7 }
  0x46   : > { %419 = vmatpush.msra.mxu0 %v408_v5  ;;  %2114 = vmatpush.msra.mxu3 %v408_v5  ;;  %v1150_v32 = vld [vmem:[#allocation7 + $0x78] sm:$0xff]  ;;  %v1149_v33 = vld [vmem:[#allocation7 + $0x70] sm:$0xff]  ;;  %v1148_v34 = vld [vmem:[#allocation7 + $0x68] sm:$0xff]  ;;  %s1981_s23 = scalar_lea.hbm %s3652_s8, %s2108_s1  ;;  %s1982_s24 = sshll.u32 %s3592_s13, 4  ;;  %s1983_s24 = int_to_ptr.vmem [resolvable:$true] %s1982_s24 }
  0x47   : > { %1151 = vmatpush.msra.mxu1 %v1150_v32  ;;  %v1147_v35 = vld [vmem:[#allocation7 + $0x60] sm:$0xff]  ;;  %v1146_v36 = vld [vmem:[#allocation7 + $0x58] sm:$0xff]  ;;  %v1145_v40 = vld [vmem:[#allocation7 + $0x50] sm:$0xff]  ;;  %s1984_s17 = sshll.u32 %s1981_s23, 4  ;;  %s1985_s17 = int_to_ptr.hbm [resolvable:$true] %s1984_s17 }
  0x48   : > { %420 = vmatpush.msra.mxu0 %v407_v6  ;;  %2115 = vmatpush.msra.mxu3 %v407_v6  ;;  %v1144_v43 = vld [vmem:[#allocation7 + $0x48] sm:$0xff]  ;;  %v1143_v46 = vld [vmem:[#allocation7 + $0x40] sm:$0xff]  ;;  %v1142_v52 = vld [vmem:[#allocation7 + $0x38] sm:$0xff]  ;;  %s2438_s10 = sshra.s32 %s1985_s17, 4  ;;  %s2439_s10 = int_to_ptr.hbm [resolvable:$true] %s2438_s10 }
  0x49   : > { %1152 = vmatpush.msra.mxu1 %v1149_v33  ;;  %v1141_v58 = vld [vmem:[#allocation7 + $0x30] sm:$0xff]  ;;  %v1140_v0 = vld [vmem:[#allocation7 + $0x28] sm:$0xff]  ;;  %v1139_v6 = vld [vmem:[#allocation7 + $0x20] sm:$0xff]  ;;  %s2440_s15 = scalar_lea.hbm %s2439_s10, 128  ;;  %p2445_p11 = scmp.lt.s32.totalorder %s2439_s10, %s3652_s8 }
  0x4a   : > { %421 = vmatpush.msra.mxu0 %v406_v7  ;;  %2116 = vmatpush.msra.mxu3 %v406_v7  ;;  %p2441_p1 = scmp.ne.s32.totalorder %s2439_s10, %s2440_s15  ;;  %p2446_p9 = scmp.lt.s32.totalorder %s2444_s26, %s2440_s15 }
  0x4b   : > { %1153 = vmatpush.msra.mxu1 %v1148_v34 }
  0x4c   : > { %422 = vmatpush.msra.mxu0 %v405_v8  ;;  %2117 = vmatpush.msra.mxu3 %v405_v8  ;;  %p2442_p4 = pnand %p2441_p1, %p2643_p3  ;;  %p2447_p2 = por %p2446_p9, %p2445_p11 }
  0x4d   : > { %1154 = vmatpush.msra.mxu1 %v1147_v35 }
  0x4e   : > { %423 = vmatpush.msra.mxu0 %v404_v9  ;;  %2118 = vmatpush.msra.mxu3 %v404_v9  ;;  %p2443_p8 = pneg %p2442_p4 }
  0x4f   : > { %1155 = vmatpush.msra.mxu1 %v1146_v36 }
  0x50   : > { %424 = vmatpush.msra.mxu0 %v403_v10  ;;  %2119 = vmatpush.msra.mxu3 %v403_v10  ;;  %p2448_p10 = pnand %p2447_p2, %p2443_p8 }
  0x51   : > { %1156 = vmatpush.msra.mxu1 %v1145_v40 }
  0x52   : > { %425 = vmatpush.msra.mxu0 %v402_v11  ;;  %2120 = vmatpush.msra.mxu3 %v402_v11 }
  0x53   : > { %1157 = vmatpush.msra.mxu1 %v1144_v43 }
  0x54   : > { %426 = vmatpush.msra.mxu0 %v401_v12  ;;  %2121 = vmatpush.msra.mxu3 %v401_v12 }
  0x55   : > { %1158 = vmatpush.msra.mxu1 %v1143_v46 }
  0x56   : > { %427 = vmatpush.msra.mxu0 %v400_v13  ;;  %2122 = vmatpush.msra.mxu3 %v400_v13 }
  0x57   : > { %1159 = vmatpush.msra.mxu1 %v1142_v52 }
  0x58   : > { %428 = vmatpush.msra.mxu0 %v399_v14  ;;  %2123 = vmatpush.msra.mxu3 %v399_v14  ;;  %v1138_v14 = vld [vmem:[#allocation7 + $0x18] sm:$0xff] }
  0x59   : > { %1160 = vmatpush.msra.mxu1 %v1141_v58 }
  0x5a   : > { %429 = vmatpush.msra.mxu0 %v398_v15  ;;  %2124 = vmatpush.msra.mxu3 %v398_v15 }
  0x5b   : > { %430 = vmatmul.f32.vlgmr.msra.gmra.mxu0 %v382_v16  ;;  %466 = vmatmul.f32.vlgmr.msra.gmra.mxu3 %v394_v17 }
  0x5c   : > { %2125 = vmatpush.msrb.mxu3 %v1150_v32  ;;  %1161 = vmatpush.msra.mxu1 %v1140_v0 }
  0x5e   : > { %2126 = vmatpush.msrb.mxu3 %v1149_v33  ;;  %1162 = vmatpush.msra.mxu1 %v1139_v6 }
  0x60   : > { %2127 = vmatpush.msrb.mxu3 %v1148_v34  ;;  %1163 = vmatpush.msra.mxu1 %v1138_v14 }
  0x62   : > { %2128 = vmatpush.msrb.mxu3 %v1147_v35 }
  0x63   : > { %433 = vmatmul.f32.gmra.mxu0 %v383_v18  ;;  %469 = vmatmul.f32.gmra.mxu3 %v395_v19 }
  0x64   : > { %2129 = vmatpush.msrb.mxu3 %v1146_v36 }
  0x66   : > { %2130 = vmatpush.msrb.mxu3 %v1145_v40 }
  0x68   : > { %2131 = vmatpush.msrb.mxu3 %v1144_v43 }
  0x6a   : > { %2132 = vmatpush.msrb.mxu3 %v1143_v46 }
  0x6b   : > { %436 = vmatmul.f32.gmra.mxu0 %v384_v20  ;;  %472 = vmatmul.f32.gmra.mxu3 %v396_v21 }
  0x6c   : > { %2133 = vmatpush.msrb.mxu3 %v1142_v52 }
  0x6e   : > { %2134 = vmatpush.msrb.mxu3 %v1141_v58 }
  0x70   : > { %2135 = vmatpush.msrb.mxu3 %v1140_v0 }
  0x72   : > { %2136 = vmatpush.msrb.mxu3 %v1139_v6 }
  0x73   : > { %439 = vmatmul.f32.gmra.mxu0 %v385_v22  ;;  %475 = vmatmul.f32.gmra.mxu3 %v397_v23  ;;  %v1137_v23 = vld [vmem:[#allocation7 + $0x10] sm:$0xff] }
  0x74   : > { %2137 = vmatpush.msrb.mxu3 %v1138_v14  ;;  %1164 = vmatpush.msra.mxu1 %v1137_v23 }
  0x76   : > { %2138 = vmatpush.msrb.mxu3 %v1137_v23 }
  0x7b   : > { %442 = vmatmul.f32.gmra.mxu0 %v386_v24 }
  0x83   : > { %445 = vmatmul.f32.gmra.mxu0 %v387_v25 }
  0x8b   : > { %448 = vmatmul.f32.gmra.mxu0 %v388_v26 }
  0x93   : > { %451 = vmatmul.f32.gmra.mxu0 %v389_v27 }
  0x9b   : > { %454 = vmatmul.f32.gmra.mxu0 %v390_v28 }
  0xa3   : > { %457 = vmatmul.f32.gmra.mxu0 %v391_v29 }
  0xab   : > { %460 = vmatmul.f32.gmra.mxu0 %v392_v30 }
  0xb3   : > { %463 = vmatmul.f32.gmra.mxu0 %v393_v31  ;;  %v1136_v31 = vld [vmem:[#allocation7 + $0x8] sm:$0xff] }
  0xb4   : > { %1165 = vmatpush.msra.mxu1 %v1136_v31  ;;  %2139 = vmatpush.msrb.mxu3 %v1136_v31 }
  0xd8   : > { %v2709_v37 = vpop.f32.mrf.mxu0 }
  0xd9   : > { %v479_v38 = vrot.slane %v2709_v37, 4  ;;  %v575_v39 = vmul.f32 %v2709_v37, %v2709_v37 }
  0xdb   : > { %v480_v41 = vadd.f32 %v479_v38, %v2709_v37  ;;  %v591_v42 = vrot.slane %v575_v39, 4 }
  0xdd   : > { %v481_v44 = vrot.slane %v480_v41, 2  ;;  %v592_v45 = vadd.f32 %v591_v42, %v575_v39  ;;  %v1135_v39 = vld [vmem:[#allocation7] sm:$0xff] }
  0xde   : > { %v2715_v47 = vpop.f32.mrf.mxu3  ;;  %1166 = vmatpush.msra.mxu1 %v1135_v39  ;;  %2140 = vmatpush.msrb.mxu3 %v1135_v39 }
  0xdf   : > { %v482_v48 = vadd.f32 %v481_v44, %v480_v41  ;;  %v593_v49 = vrot.slane %v592_v45, 2  ;;  %v551_v50 = vrot.slane %v2715_v47, 4  ;;  %v587_v51 = vmul.f32 %v2715_v47, %v2715_v47 }
  0xe0   : > { %v2720_v53 = vpop.f32.mrf.mxu0 }
  0xe1   : > { %v483_v54 = vrot.slane %v482_v48, 1  ;;  %v594_v55 = vadd.f32 %v593_v49, %v592_v45  ;;  %v552_v56 = vadd.f32 %v551_v50, %v2715_v47  ;;  %v663_v57 = vrot.slane %v587_v51, 4 }
  0xe2   : > { %v485_v59 = vrot.slane %v2720_v53, 4  ;;  %v576_v60 = vmul.f32 %v2720_v53, %v2720_v53 }
  0xe3   : > { %v595_v61 = vrot.slane %v594_v55, 1  ;;  %v553_v62 = vrot.slane %v552_v56, 2  ;;  %v664_v63 = vadd.f32 %v663_v57, %v587_v51  ;;  %v484_v1 = vadd.f32 %v483_v54, %v482_v48 }
  0xe4   : > { %v597_v2 = vrot.slane %v576_v60, 4  ;;  %v486_v12 = vadd.f32 %v485_v59, %v2720_v53 }
  0xe5   : > { %v596_v3 = vadd.f32 %v595_v61, %v594_v55  ;;  %v554_v4 = vadd.f32 %v553_v62, %v552_v56  ;;  %v665_v5 = vrot.slane %v664_v63, 2  ;;  %v2726_v7 = vmul.f32 0.125, %v484_v1 }
  0xe6   : > { %v598_v8 = vadd.f32 %v597_v2, %v576_v60  ;;  %v2728_v9 = vpop.f32.mrf.mxu3  ;;  %v487_v29 = vrot.slane %v486_v12, 2 }
  0xe7   : > { %v555_v10 = vrot.slane %v554_v4, 1  ;;  %v666_v11 = vadd.f32 %v665_v5, %v664_v63  ;;  %v557_v13 = vrot.slane %v2728_v9, 4  ;;  %v703_v15 = vmul.f32 0.125, %v596_v3 }
  0xe8   : > { %v599_v16 = vrot.slane %v598_v8, 2  ;;  %v588_v17 = vmul.f32 %v2728_v9, %v2728_v9  ;;  %v2734_v18 = vpop.f32.mrf.mxu0  ;;  %v719_v19 = vmul.f32 %v2726_v7, %v2726_v7  ;;  %v488_v45 = vadd.f32 %v487_v29, %v486_v12 }
  0xe9   : > { %v556_v20 = vadd.f32 %v555_v10, %v554_v4  ;;  %v667_v21 = vrot.slane %v666_v11, 1  ;;  %v558_v22 = vadd.f32 %v557_v13, %v2728_v9  ;;  %v491_v25 = vrot.slane %v2734_v18, 4 }
  0xea   : > { %v669_v24 = vrot.slane %v588_v17, 4  ;;  %v577_v26 = vmul.f32 %v2734_v18, %v2734_v18  ;;  %v600_v30 = vadd.f32 %v599_v16, %v598_v8  ;;  %v735_v34 = vsub.f32 %v703_v15, %v719_v19 }
  0xeb   : > { %v668_v27 = vadd.f32 %v667_v21, %v666_v11  ;;  %v2742_v28 = vmul.f32 0.125, %v556_v20  ;;  %v559_v38 = vrot.slane %v558_v22, 2  ;;  %v492_v41 = vadd.f32 %v491_v25, %v2734_v18 }
  0xec   : > { %v670_v32 = vadd.f32 %v669_v24, %v588_v17  ;;  %v603_v33 = vrot.slane %v577_v26, 4  ;;  %v601_v46 = vrot.slane %v600_v30, 1  ;;  %v751_v54 = vmax.f32 %v735_v34, 0.0 }
  0xed   : > { %v715_v35 = vmul.f32 0.125, %v668_v27  ;;  %v731_v36 = vmul.f32 %v2742_v28, %v2742_v28  ;;  %v2754_v56 = vadd.f32 %v559_v38, %v558_v22  ;;  %v493_v59 = vrot.slane %v492_v41, 2 }
  0xee   : > { %v671_v40 = vrot.slane %v670_v32, 2  ;;  %v604_v42 = vadd.f32 %v603_v33, %v577_v26  ;;  %v2747_v43 = vpop.f32.mrf.mxu3  ;;  %v602_v0 = vadd.f32 %v601_v46, %v600_v30  ;;  %v2763_v5 = vadd.f32 0.0001, %v751_v54 }
  0xef   : > { %v747_v44 = vsub.f32 %v715_v35, %v731_v36  ;;  %v563_v48 = vrot.slane %v2747_v43, 4  ;;  %v589_v51 = vmul.f32 %v2747_v43, %v2747_v43  ;;  %v489_v6 = vrot.slane %v488_v45, 1 }
  0xf0   : > { %v672_v49 = vadd.f32 %v671_v40, %v670_v32  ;;  %v605_v50 = vrot.slane %v604_v42, 2  ;;  %v2752_v52 = vpop.f32.mrf.mxu0  ;;  %v561_v8 = vrot.slane %v2754_v56, 1  ;;  %v2767_v11 = vadd.f32 %v493_v59, %v492_v41 }
  0xf1   : > { %v763_v55 = vmax.f32 %v747_v44, 0.0  ;;  %v564_v57 = vadd.f32 %v563_v48, %v2747_v43  ;;  %v497_v58 = vrot.slane %v2752_v52, 4  ;;  %v675_v61 = vrot.slane %v589_v51, 4 }
  0xf2   : > { %v606_v60 = vadd.f32 %v605_v50, %v604_v42  ;;  %v578_v62 = vmul.f32 %v2752_v52, %v2752_v52  ;;  %v673_v2 = vrot.slane %v672_v49, 1  ;;  %v2771_v16 = vmul.f32 0.125, %v602_v0 }
  0xf3   : > { %v2760_v63 = vadd.f32 0.0001, %v763_v55  ;;  %v498_v1 = vadd.f32 %v497_v58, %v2752_v52  ;;  %v676_v3 = vadd.f32 %v675_v61, %v589_v51  ;;  %v565_v10 = vrot.slane %v564_v57, 2 }
  0xf4   : > { %v609_v4 = vrot.slane %v578_v62, 4  ;;  %v607_v12 = vrot.slane %v606_v60, 1  ;;  %v674_v21 = vadd.f32 %v673_v2, %v672_v49  ;;  %v490_v39 = vadd.f32 %v489_v6, %v488_v45 }
  0xf5   : > { %2238 = vrsqrt.f32 %v2760_v63  ;;  %v677_v13 = vrot.slane %v676_v3, 2  ;;  %v499_v17 = vrot.slane %v498_v1, 2  ;;  %v2779_v25 = vadd.f32 %v565_v10, %v564_v57 }
  0xf6   : > { %v610_v14 = vadd.f32 %v609_v4, %v578_v62  ;;  %v2769_v15 = vpop.f32.mrf.mxu3  ;;  %2240 = vrsqrt.f32 %v2763_v5  ;;  %v608_v30 = vadd.f32 %v607_v12, %v606_v60  ;;  %vm909_vm0 = vweird.f32 %v2760_v63 }
  0xf7   : > { %v569_v19 = vrot.slane %v2769_v15, 4  ;;  %v590_v20 = vmul.f32 %v2769_v15, %v2769_v15  ;;  %v678_v22 = vadd.f32 %v677_v13, %v676_v3  ;;  %v2785_v35 = vadd.f32 %v499_v17, %v498_v1 }
  0xf8   : > { %v611_v23 = vrot.slane %v610_v14, 2  ;;  %v2776_v24 = vpop.f32.mrf.mxu0  ;;  %v495_v41 = vrot.slane %v2767_v11, 1  ;;  %v2793_v54 = vmul.f32 0.125, %v674_v21  ;;  %v567_v55 = vrot.slane %v2779_v25, 1 }
  0xf9   : > { %v570_v26 = vadd.f32 %v569_v19, %v2769_v15  ;;  %v681_v27 = vrot.slane %v590_v20, 4  ;;  %v503_v29 = vrot.slane %v2776_v24, 4  ;;  %v679_v31 = vrot.slane %v678_v22, 1 }
  0xfa   : > { %v612_v32 = vadd.f32 %v611_v23, %v610_v14  ;;  %v579_v33 = vmul.f32 %v2776_v24, %v2776_v24  ;;  %v2796_v57 = vmul.f32 0.125, %v490_v39  ;;  %v2798_v45 = vmul.f32 0.125, %v608_v30 }
  0xfb   : > { %v2239_v34 = vpop.eup %2238  ;;  %v682_v36 = vadd.f32 %v681_v27, %v590_v20  ;;  %v504_v38 = vadd.f32 %v503_v29, %v2776_v24  ;;  %v571_v42 = vrot.slane %v570_v26, 2  ;;  %v680_v44 = vadd.f32 %v679_v31, %v678_v22 }
  0xfc   : > { %v904_v40 = vmul.f32 %v2239_v34, %v2760_v63  ;;  %v613_v46 = vrot.slane %v612_v32, 1  ;;  %v615_v49 = vrot.slane %v579_v33, 4  ;;  %v2791_v50 = vpop.eup %2240  ;;  %v501_v58 = vrot.slane %v2785_v35, 1 }
  0xfd   : > { %v683_v48 = vrot.slane %v682_v36, 2  ;;  %v505_v59 = vrot.slane %v504_v38, 2  ;;  %vm910_vm1 = vweird.f32 %v2239_v34  ;;  %v2801_v62 = vadd.f32 %v571_v42, %v570_v26 }
  0xfe   : > { %v905_v51 = vmul.f32 %v2239_v34, %v904_v40  ;;  %v616_v60 = vadd.f32 %v615_v49, %v579_v33  ;;  %v784_v1 = vmul.f32 %v2791_v50, %v2763_v5  ;;  %vm789_vm2 = vweird.f32 %v2763_v5  ;;  %vm2817_vm3 = vmor %vm909_vm0, %vm910_vm1  ;;  %v2864_v5 = vld [vmem:[%s3647_s3] sm:$0x1] }
  0xff   : > { %v2808_v2 = vmul.f32 0.125, %v680_v44  ;;  %v614_v3 = vadd.f32 %v613_v46, %v612_v32  ;;  %v684_v4 = vadd.f32 %v683_v48, %v682_v36  ;;  %v720_v14 = vmul.f32 %v2796_v57, %v2796_v57  ;;  %v2835_v32 = vld [vmem:[%s3646_s2] sm:$0x1] }
 0x100   : > { %v906_v61 = vmul.f32 0.5, %v905_v51  ;;  %v2803_v0 = vpop.f32.mrf.mxu0  ;;  %v617_v6 = vrot.slane %v616_v60, 2  ;;  %v785_v13 = vmul.f32 %v2791_v50, %v784_v1  ;;  %v2821_v19 = vadd.f32 %v505_v59, %v504_v38 }
 0x101   : > { %v580_v12 = vmul.f32 %v2803_v0, %v2803_v0  ;;  %v509_v21 = vrot.slane %v2803_v0, 4  ;;  %v562_v22 = vadd.f32 %v561_v8, %v2754_v56  ;;  %v736_v29 = vsub.f32 %v2771_v16, %v720_v14 }
 0x102   : > { %v907_v10 = vsub.f32 1.5, %v906_v61  ;;  %v618_v20 = vadd.f32 %v617_v6, %v616_v60  ;;  %v786_v27 = vmul.f32 0.5, %v785_v13  ;;  %v573_v63 = vrot.slane %v2801_v62, 1 }
 0x103   : > { %v621_v26 = vrot.slane %v580_v12, 4  ;;  %v685_v30 = vrot.slane %v684_v4, 1  ;;  %vm790_vm4 = vweird.f32 %v2791_v50  ;;  %v2830_v31 = vmul.f32 0.125, %v562_v22 }
 0x104   : > { %v908_v23 = vmul.f32 %v2239_v34, %v907_v10  ;;  %v787_v33 = vsub.f32 1.5, %v786_v27  ;;  %v752_v36 = vmax.f32 %v736_v29, 0.0  ;;  %v2840_v38 = vmul.f32 0.125, %v614_v3  ;;  %vm791_vm5 = vmor %vm789_vm2, %vm790_vm4 }
 0x105   : > { %v622_v8 = vadd.f32 %v621_v26, %v580_v12  ;;  %v619_v39 = vrot.slane %v618_v20, 1  ;;  %v510_v40 = vadd.f32 %v509_v21, %v2803_v0  ;;  %v507_v42 = vrot.slane %v2821_v19, 1 }
 0x106   : > { %v912_v56 = vsel %vm2817_vm3, %v2239_v34, %v908_v23  ;;  %v788_v48 = vmul.f32 %v2791_v50, %v787_v33  ;;  %v2847_v49 = vadd.f32 0.0001, %v752_v36  ;;  %v686_v51 = vadd.f32 %v685_v30, %v684_v4 }
 0x107   : > { %v955_v16 = vmul.f32 %v912_v56, %v2835_v32  ;;  %v623_v44 = vrot.slane %v622_v8, 2  ;;  %v732_v59 = vmul.f32 %v2830_v31, %v2830_v31  ;;  %v496_v60 = vadd.f32 %v495_v41, %v2767_v11 }
 0x108   : > { %v2844_v46 = vpop.f32.mrf.mxu0  ;;  %v792_v3 = vsel %vm791_vm5, %v2791_v50, %v788_v48  ;;  %v620_v4 = vadd.f32 %v619_v39, %v618_v20  ;;  %v511_v10 = vrot.slane %v510_v40, 2  ;;  %2242 = vrsqrt.f32 %v2847_v49 }
 0x109   : > { %v1019_v34 = vperm.slane %v955_v16, 0  ;;  %v515_v61 = vrot.slane %v2844_v46, 4  ;;  %v581_v1 = vmul.f32 %v2844_v46, %v2844_v46  ;;  %v971_v6 = vmul.f32 %v955_v16, %v2742_v28 }
 0x10a   : > { %v943_v12 = vmul.f32 %v792_v3, %v2835_v32  ;;  %v624_v41 = vadd.f32 %v623_v44, %v622_v8  ;;  %v2870_v50 = vmul.f32 0.125, %v686_v51  ;;  %v748_v20 = vsub.f32 %v2793_v54, %v732_v59 }
 0x10b   : > { %v1051_v11 = vmul.f32 %v1019_v34, %v2715_v47  ;;  %v627_v13 = vrot.slane %v581_v1, 4  ;;  %v987_v14 = vsub.f32 %v2864_v5, %v971_v6  ;;  %v516_v21 = vadd.f32 %v515_v61, %v2844_v46 }
 0x10c   : > { %v959_v28 = vmul.f32 %v943_v12, %v2726_v7  ;;  %v1007_v17 = vperm.slane %v943_v12, 0  ;;  %v2875_v26 = vmul.f32 0.125, %v496_v60  ;;  %v2877_v27 = vmul.f32 0.125, %v620_v4 }
 0x10d   : > { %v628_v22 = vadd.f32 %v627_v13, %v581_v1  ;;  %v1083_v23 = vperm.slane %v987_v14, 0  ;;  %v2879_v47 = vadd.f32 %v511_v10, %v510_v40  ;;  %v764_v30 = vmax.f32 %v748_v20, 0.0 }
 0x10e   : > { %v975_v29 = vsub.f32 %v2864_v5, %v959_v28  ;;  %v625_v56 = vrot.slane %v624_v41, 1  ;;  %v721_v54 = vmul.f32 %v2875_v26, %v2875_v26  ;;  %v2243_v36 = vpop.eup %2242  ;;  %v1039_v16 = vmul.f32 %v1007_v17, %v2709_v37 }
 0x10f   : > { %v629_v8 = vrot.slane %v628_v22, 2  ;;  %v1115_v7 = vadd.f32 %v1083_v23, %v1051_v11  ;;  %v517_v48 = vrot.slane %v516_v21, 2  ;;  %v794_v59 = vmul.f32 %v2243_v36, %v2847_v49 }
 0x110   : > { %v2882_v33 = vpop.f32.mrf.mxu0  ;;  %v1071_v39 = vperm.slane %v975_v29, 0  ;;  %v2892_v3 = vadd.f32 0.0001, %v764_v30  ;;  %v626_v6 = vadd.f32 %v625_v56, %v624_v41  ;;  %v737_v4 = vsub.f32 %v2798_v45, %v721_v54 }
 0x111   : > { %v521_v44 = vrot.slane %v2882_v33, 4  ;;  %v582_v40 = vmul.f32 %v2882_v33, %v2882_v33  ;;  %v630_v34 = vadd.f32 %v629_v8, %v628_v22  ;;  %v1131_v51 = vmax.f32 %v1115_v7, 0.0 }
 0x112   : > { %v1103_v60 = vadd.f32 %v1071_v39, %v1039_v16  ;;  %v795_v37 = vmul.f32 %v2243_v36, %v794_v59  ;;  %v568_v10 = vadd.f32 %v567_v55, %v2779_v25  ;;  %2244 = vrsqrt.f32 %v2892_v3 }
 0x113   : > { %v522_v61 = vadd.f32 %v521_v44, %v2882_v33  ;;  %v633_v1 = vrot.slane %v582_v40, 4  ;;  %1203 = vmatmul.f32.vlgmr.msrb.gmra.mxu3 %v1131_v51  ;;  %v631_v12 = vrot.slane %v630_v34, 1  ;;  %v513_v14 = vrot.slane %v2879_v47, 1 }
 0x114   : > { %v1119_v11 = vmax.f32 %v1103_v60, 0.0  ;;  %v2900_v28 = vadd.f32 %v517_v48, %v516_v21  ;;  %v796_v17 = vmul.f32 0.5, %v795_v37  ;;  %v753_v20 = vmax.f32 %v737_v4, 0.0 }
 0x115   : > { %v634_v13 = vadd.f32 %v633_v1, %v582_v40  ;;  %v523_v41 = vrot.slane %v522_v61, 2  ;;  %v2902_v23 = vmul.f32 0.125, %v568_v10  ;;  %v502_v25 = vadd.f32 %v501_v58, %v2785_v35 }
 0x116   : > { %1167 = vmatmul.f32.vlgmr.msra.gmra.mxu1 %v1119_v11  ;;  %v797_v55 = vsub.f32 1.5, %v796_v17  ;;  %vm799_vm6 = vweird.f32 %v2847_v49  ;;  %vm800_vm7 = vweird.f32 %v2243_v36  ;;  %v2910_v29 = vadd.f32 0.0001, %v753_v20 }
 0x117   : > { %v635_v22 = vrot.slane %v634_v13, 2  ;;  %v2912_v21 = vmul.f32 0.125, %v626_v6  ;;  %v632_v30 = vadd.f32 %v631_v12, %v630_v34  ;;  %v519_v7 = vrot.slane %v2900_v28, 1  ;;  %vm801_vm8 = vmor %vm799_vm6, %vm800_vm7 }
 0x118   : > { %v2908_v45 = vpop.f32.mrf.mxu0  ;;  %v798_v54 = vmul.f32 %v2243_v36, %v797_v55  ;;  %2246 = vrsqrt.f32 %v2910_v29  ;;  %v733_v35 = vmul.f32 %v2902_v23, %v2902_v23  ;;  %v2245_v58 = vpop.eup %2244  ;;  %v2920_v49 = vadd.f32 %v523_v41, %v522_v61 }
 0x119   : > { %v636_v56 = vadd.f32 %v635_v22, %v634_v13  ;;  %v583_v8 = vmul.f32 %v2908_v45, %v2908_v45  ;;  %v527_v16 = vrot.slane %v2908_v45, 4  ;;  %v2923_v44 = vmul.f32 0.125, %v502_v25 }
 0x11a   : > { %v802_v40 = vsel %vm801_vm8, %v2243_v36, %v798_v54  ;;  %v914_v48 = vmul.f32 %v2245_v58, %v2892_v3  ;;  %vm919_vm9 = vweird.f32 %v2892_v3  ;;  %v749_v34 = vsub.f32 %v2808_v2, %v733_v35 }
 0x11b   : > { %v639_v39 = vrot.slane %v583_v8, 4  ;;  %v2928_v51 = vmul.f32 0.125, %v632_v30  ;;  %v637_v59 = vrot.slane %v636_v56, 1  ;;  %v944_v60 = vmul.f32 %v802_v40, %v2835_v32 }
 0x11c   : > { %v915_v1 = vmul.f32 %v2245_v58, %v914_v48  ;;  %v765_v6 = vmax.f32 %v749_v34, 0.0  ;;  %v722_v37 = vmul.f32 %v2923_v44, %v2923_v44  ;;  %v574_v36 = vadd.f32 %v573_v63, %v2801_v62 }
 0x11d   : > { %v640_v61 = vadd.f32 %v639_v39, %v583_v8  ;;  %v525_v4 = vrot.slane %v2920_v49, 1  ;;  %v960_v10 = vmul.f32 %v944_v60, %v2796_v57  ;;  %v1008_v2 = vperm.slane %v944_v60, 0 }
 0x11e   : > { %v528_v12 = vadd.f32 %v527_v16, %v2908_v45  ;;  %v2247_v11 = vpop.eup %2246  ;;  %v916_v17 = vmul.f32 0.5, %v915_v1  ;;  %vm920_vm10 = vweird.f32 %v2245_v58  ;;  %v2941_v41 = vadd.f32 0.0001, %v765_v6 }
 0x11f   : > { %v641_v13 = vrot.slane %v640_v61, 2  ;;  %v638_v22 = vadd.f32 %v637_v59, %v636_v56  ;;  %v976_v25 = vsub.f32 %v2864_v5, %v960_v10  ;;  %v804_v62 = vmul.f32 %v2247_v11, %v2910_v29  ;;  %vm2953_vm12 = vmor %vm919_vm9, %vm920_vm10 }
 0x120   : > { %v2939_v20 = vpop.f32.mrf.mxu0  ;;  %vm809_vm11 = vweird.f32 %v2910_v29  ;;  %v738_v57 = vsub.f32 %v2840_v38, %v722_v37  ;;  %v1040_v63 = vmul.f32 %v1008_v2, %v2720_v53  ;;  %v917_v55 = vsub.f32 1.5, %v916_v17 }
 0x121   : > { %v533_v30 = vrot.slane %v2939_v20, 4  ;;  %v2949_v8 = vmul.f32 0.125, %v574_v36  ;;  %v1072_v54 = vperm.slane %v976_v25, 0  ;;  %v805_v35 = vmul.f32 %v2247_v11, %v804_v62 }
 0x122   : > { %v584_v16 = vmul.f32 %v2939_v20, %v2939_v20  ;;  %2248 = vrsqrt.f32 %v2941_v41  ;;  %v529_v38 = vrot.slane %v528_v12, 2  ;;  %v642_v53 = vadd.f32 %v641_v13, %v640_v61 }
 0x123   : > { %v918_v39 = vmul.f32 %v2245_v58, %v917_v55  ;;  %v534_v40 = vadd.f32 %v533_v30, %v2939_v20  ;;  %v1104_v48 = vadd.f32 %v1072_v54, %v1040_v63  ;;  %v806_v34 = vmul.f32 0.5, %v805_v35 }
 0x124   : > { %v645_v59 = vrot.slane %v584_v16, 4  ;;  %v754_v60 = vmax.f32 %v738_v57, 0.0  ;;  %v2961_v3 = vmul.f32 0.125, %v638_v22  ;;  %vm810_vm13 = vweird.f32 %v2247_v11 }
 0x125   : > { %v922_v1 = vsel %vm2953_vm12, %v2245_v58, %v918_v39  ;;  %v734_v6 = vmul.f32 %v2949_v8, %v2949_v8  ;;  %v1120_v37 = vmax.f32 %v1104_v48, 0.0  ;;  %v807_v61 = vsub.f32 1.5, %v806_v34  ;;  %vm811_vm14 = vmor %vm809_vm11, %vm810_vm13 }
 0x126   : > { %v956_v36 = vmul.f32 %v922_v1, %v2835_v32  ;;  %v646_v10 = vadd.f32 %v645_v59, %v584_v16  ;;  %v643_v2 = vrot.slane %v642_v53, 1  ;;  %v535_v13 = vrot.slane %v534_v40, 2 }
 0x127   : > { %v2968_v17 = vadd.f32 0.0001, %v754_v60  ;;  %v750_v25 = vsub.f32 %v2870_v50, %v734_v6  ;;  %1170 = vmatmul.f32.gmra.mxu1 %v1120_v37  ;;  %v808_v57 = vmul.f32 %v2247_v11, %v807_v61  ;;  %v2974_v30 = vadd.f32 %v529_v38, %v528_v12 }
 0x128   : > { %v2249_v22 = vpop.eup %2248  ;;  %v972_v62 = vmul.f32 %v956_v36, %v2830_v31  ;;  %v1020_v58 = vperm.slane %v956_v36, 0  ;;  %v647_v63 = vrot.slane %v646_v10, 2  ;;  %v2972_v55 = vpop.f32.mrf.mxu0  ;;  %vm929_vm15 = vweird.f32 %v2941_v41 }
 0x129   : > { %v924_v54 = vmul.f32 %v2249_v22, %v2941_v41  ;;  %2250 = vrsqrt.f32 %v2968_v17  ;;  %v812_v56 = vsel %vm811_vm14, %v2247_v11, %v808_v57  ;;  %v644_v16 = vadd.f32 %v643_v2, %v642_v53 }
 0x12a   : > { %v988_v50 = vsub.f32 %v2864_v5, %v972_v62  ;;  %v1052_v31 = vmul.f32 %v1020_v58, %v2728_v9  ;;  %v648_v35 = vadd.f32 %v647_v63, %v646_v10  ;;  %v945_v12 = vmul.f32 %v812_v56, %v2835_v32 }
 0x12b   : > { %v925_v38 = vmul.f32 %v2249_v22, %v924_v54  ;;  %v539_v39 = vrot.slane %v2972_v55, 4  ;;  %v2986_v48 = vadd.f32 %v535_v13, %v534_v40  ;;  %vm930_vm0 = vweird.f32 %v2249_v22 }
 0x12c   : > { %v1084_v29 = vperm.slane %v988_v50, 0  ;;  %v766_v34 = vmax.f32 %v750_v25, 0.0  ;;  %v961_v59 = vmul.f32 %v945_v12, %v2875_v26  ;;  %v1009_v60 = vperm.slane %v945_v12, 0  ;;  %vm3004_vm1 = vmor %vm929_vm15, %vm930_vm0 }
 0x12d   : > { %v926_v1 = vmul.f32 0.5, %v925_v38  ;;  %v585_v9 = vmul.f32 %v2972_v55, %v2972_v55  ;;  %v531_v11 = vrot.slane %v2974_v30, 1  ;;  %v649_v6 = vrot.slane %v648_v35, 1 }
 0x12e   : > { %v1116_v53 = vadd.f32 %v1084_v29, %v1052_v31  ;;  %v2992_v37 = vadd.f32 0.0001, %v766_v34  ;;  %v2994_v61 = vmul.f32 0.125, %v644_v16  ;;  %v977_v40 = vsub.f32 %v2864_v5, %v961_v59 }
 0x12f   : > { %v2251_v36 = vpop.eup %2250  ;;  %v927_v10 = vsub.f32 1.5, %v926_v1  ;;  %v2998_v2 = vadd.f32 %v539_v39, %v2972_v55  ;;  %v537_v13 = vrot.slane %v2986_v48, 1  ;;  %vm819_vm2 = vweird.f32 %v2968_v17 }
 0x130   : > { %v1132_v26 = vmax.f32 %v1116_v53, 0.0  ;;  %v814_v62 = vmul.f32 %v2251_v36, %v2968_v17  ;;  %v1041_v58 = vmul.f32 %v1009_v60, %v2734_v18  ;;  %v1073_v57 = vperm.slane %v977_v40, 0 }
 0x131   : > { %v928_v63 = vmul.f32 %v2249_v22, %v927_v10  ;;  %v651_v54 = vrot.slane %v585_v9, 4  ;;  %v650_v50 = vadd.f32 %v649_v6, %v648_v35  ;;  %2252 = vrsqrt.f32 %v2992_v37 }
 0x132   : > { %1206 = vmatmul.f32.gmra.mxu3 %v1132_v26  ;;  %v815_v31 = vmul.f32 %v2251_v36, %v814_v62  ;;  %v508_v41 = vadd.f32 %v507_v42, %v2821_v19  ;;  %v1105_v56 = vadd.f32 %v1073_v57, %v1041_v58  ;;  %vm820_vm3 = vweird.f32 %v2251_v36 }
 0x133   : > { %v932_v16 = vsel %vm3004_vm1, %v2249_v22, %v928_v63  ;;  %v541_v12 = vrot.slane %v2998_v2, 2  ;;  %v514_v35 = vadd.f32 %v513_v14, %v2879_v47  ;;  %v652_v34 = vadd.f32 %v651_v54, %v585_v9  ;;  %vm821_vm4 = vmor %vm819_vm2, %vm820_vm3  ;;  %v3057_v54 = vpop.f32.mrf.mxu0 }
 0x134   : > { %v957_v18 = vmul.f32 %v932_v16, %v2835_v32  ;;  %v816_v38 = vmul.f32 0.5, %v815_v31  ;;  %v3019_v39 = vmul.f32 0.125, %v508_v41  ;;  %v1121_v29 = vmax.f32 %v1105_v56, 0.0 }
 0x135   : > { %v520_v19 = vadd.f32 %v519_v7, %v2900_v28  ;;  %v526_v42 = vadd.f32 %v525_v4, %v2920_v49  ;;  %v3033_v53 = vmul.f32 0.125, %v650_v50  ;;  %v3035_v47 = vmul.f32 0.125, %v514_v35 }
 0x136   : > { %v973_v22 = vmul.f32 %v957_v18, %v2902_v23  ;;  %v1021_v59 = vperm.slane %v957_v18, 0  ;;  %v817_v60 = vsub.f32 1.5, %v816_v38  ;;  %v723_v1 = vmul.f32 %v3019_v39, %v3019_v39  ;;  %1173 = vmatmul.f32.gmra.mxu1 %v1121_v29 }
 0x137   : > { %v3037_v14 = vmul.f32 0.125, %v520_v19  ;;  %v3039_v9 = vmul.f32 0.125, %v526_v42  ;;  %v2253_v28 = vpop.eup %2252  ;;  %v653_v6 = vrot.slane %v652_v34, 2  ;;  %vm939_vm5 = vweird.f32 %v2992_v37 }
 0x138   : > { %v989_v7 = vsub.f32 %v2864_v5, %v973_v22  ;;  %v1053_v49 = vmul.f32 %v1021_v59, %v2747_v43  ;;  %v818_v23 = vmul.f32 %v2251_v36, %v817_v60  ;;  %v739_v4 = vsub.f32 %v2877_v27, %v723_v1 }
 0x139   : > { %v934_v40 = vmul.f32 %v2253_v28, %v2992_v37  ;;  %v724_v10 = vmul.f32 %v3035_v47, %v3035_v47  ;;  %v725_v43 = vmul.f32 %v3037_v14, %v3037_v14  ;;  %vm940_vm6 = vweird.f32 %v2253_v28 }
 0x13a   : > { %v1085_v26 = vperm.slane %v989_v7, 0  ;;  %v822_v25 = vsel %vm821_vm4, %v2251_v36, %v818_v23  ;;  %v755_v62 = vmax.f32 %v739_v4, 0.0  ;;  %v726_v36 = vmul.f32 %v3039_v9, %v3039_v9  ;;  %vm3073_vm7 = vmor %vm939_vm5, %vm940_vm6 }
 0x13b   : > { %v946_v27 = vmul.f32 %v822_v25, %v2835_v32  ;;  %v935_v58 = vmul.f32 %v2253_v28, %v934_v40  ;;  %v740_v17 = vsub.f32 %v2912_v21, %v724_v10  ;;  %v741_v50 = vsub.f32 %v2928_v51, %v725_v43 }
 0x13c   : > { %v1117_v57 = vadd.f32 %v1085_v26, %v1053_v49  ;;  %v3055_v63 = vadd.f32 0.0001, %v755_v62  ;;  %v545_v16 = vrot.slane %v3057_v54, 4  ;;  %v654_v38 = vadd.f32 %v653_v6, %v652_v34 }
 0x13d   : > { %v962_v31 = vmul.f32 %v946_v27, %v2923_v44  ;;  %v1010_v41 = vperm.slane %v946_v27, 0  ;;  %v936_v56 = vmul.f32 0.5, %v935_v58  ;;  %v586_v21 = vmul.f32 %v3057_v54, %v3057_v54 }
 0x13e   : > { %v1133_v18 = vmax.f32 %v1117_v57, 0.0  ;;  %2254 = vrsqrt.f32 %v3055_v63  ;;  %v546_v19 = vadd.f32 %v545_v16, %v3057_v54  ;;  %v756_v42 = vmax.f32 %v740_v17, 0.0 }
 0x13f   : > { %v978_v35 = vsub.f32 %v2864_v5, %v962_v31  ;;  %v1042_v51 = vmul.f32 %v1010_v41, %v2752_v52  ;;  %v937_v29 = vsub.f32 1.5, %v936_v56  ;;  %v657_v34 = vrot.slane %v586_v21, 4 }
 0x140   : > { %1209 = vmatmul.f32.gmra.mxu3 %v1133_v18  ;;  %v757_v22 = vmax.f32 %v741_v50, 0.0  ;;  %v742_v59 = vsub.f32 %v2961_v3, %v726_v36  ;;  %v547_v7 = vrot.slane %v546_v19, 2  ;;  %v532_v52 = vadd.f32 %v531_v11, %v2974_v30 }
 0x141   : > { %v1074_v60 = vperm.slane %v978_v35, 0  ;;  %v938_v1 = vmul.f32 %v2253_v28, %v937_v29  ;;  %v3084_v37 = vadd.f32 %v541_v12, %v2998_v2  ;;  %v658_v49 = vadd.f32 %v657_v34, %v586_v21 }
 0x142   : > { %v3086_v23 = vadd.f32 0.0001, %v756_v42  ;;  %v3088_v4 = vadd.f32 0.0001, %v757_v22  ;;  %v548_v40 = vadd.f32 %v547_v7, %v546_v19  ;;  %v758_v10 = vmax.f32 %v742_v59, 0.0 }
 0x143   : > { %v1106_v6 = vadd.f32 %v1074_v60, %v1042_v51  ;;  %v942_v3 = vsel %vm3073_vm7, %v2253_v28, %v938_v1  ;;  %v659_v30 = vrot.slane %v658_v49, 2  ;;  %v3094_v11 = vmul.f32 0.125, %v532_v52 }
 0x144   : > { %v2255_v26 = vpop.eup %2254  ;;  %v958_v25 = vmul.f32 %v942_v3, %v2835_v32  ;;  %2256 = vrsqrt.f32 %v3086_v23  ;;  %v655_v12 = vrot.slane %v654_v38, 1  ;;  %v549_v43 = vrot.slane %v548_v40, 1 }
 0x145   : > { %v1122_v2 = vmax.f32 %v1106_v6, 0.0  ;;  %v824_v62 = vmul.f32 %v2255_v26, %v3055_v63  ;;  %v660_v17 = vadd.f32 %v659_v30, %v658_v49  ;;  %2258 = vrsqrt.f32 %v3088_v4 }
 0x146   : > { %v974_v27 = vmul.f32 %v958_v25, %v2949_v8  ;;  %v1022_v58 = vperm.slane %v958_v25, 0  ;;  %v543_v28 = vrot.slane %v3084_v37, 1  ;;  %v550_v50 = vadd.f32 %v549_v43, %v548_v40 }
 0x147   : > { %1176 = vmatmul.f32.gmra.mxu1 %v1122_v2  ;;  %v825_v57 = vmul.f32 %v2255_v26, %v824_v62  ;;  %v3100_v36 = vadd.f32 0.0001, %v758_v10  ;;  %v661_v56 = vrot.slane %v660_v17, 1  ;;  %v727_v16 = vmul.f32 %v3094_v11, %v3094_v11 }
 0x148   : > { %v990_v31 = vsub.f32 %v2864_v5, %v974_v27  ;;  %v1054_v41 = vmul.f32 %v1022_v58, %v2769_v15  ;;  %v656_v8 = vadd.f32 %v655_v12, %v654_v38  ;;  %v3106_v21 = vmul.f32 0.125, %v550_v50 }
 0x149   : > { %v826_v18 = vmul.f32 0.5, %v825_v57  ;;  %2260 = vrsqrt.f32 %v3100_v36  ;;  %v662_v29 = vadd.f32 %v661_v56, %v660_v17  ;;  %v743_v19 = vsub.f32 %v2994_v61, %v727_v16 }
 0x14a   : > { %v2257_v35 = vpop.eup %2256  ;;  %v1086_v51 = vperm.slane %v990_v31, 0  ;;  %v538_v44 = vadd.f32 %v537_v13, %v2986_v48  ;;  %vm830_vm8 = vweird.f32 %v2255_v26  ;;  %v730_v34 = vmul.f32 %v3106_v21, %v3106_v21 }
 0x14b   : > { %v827_v15 = vsub.f32 1.5, %v826_v18  ;;  %v834_v38 = vmul.f32 %v2257_v35, %v3086_v23  ;;  %v2259_v42 = vpop.eup %2258  ;;  %v714_v59 = vmul.f32 0.125, %v662_v29  ;;  %v759_v60 = vmax.f32 %v743_v19, 0.0 }
 0x14c   : > { %v1118_v22 = vadd.f32 %v1086_v51, %v1054_v41  ;;  %v3116_v1 = vmul.f32 0.125, %v538_v44  ;;  %vm829_vm9 = vweird.f32 %v3055_v63  ;;  %v844_v52 = vmul.f32 %v2259_v42, %v3088_v4 }
 0x14d   : > { %v828_v7 = vmul.f32 %v2255_v26, %v827_v15  ;;  %v835_v61 = vmul.f32 %v2257_v35, %v834_v38  ;;  %v3120_v48 = vmul.f32 0.125, %v656_v8  ;;  %vm831_vm10 = vmor %vm829_vm9, %vm830_vm8  ;;  %v746_v49 = vsub.f32 %v714_v59, %v730_v34 }
 0x14e   : > { %v1134_v13 = vmax.f32 %v1118_v22, 0.0  ;;  %v3122_v6 = vadd.f32 0.0001, %v759_v60  ;;  %v845_v25 = vmul.f32 %v2259_v42, %v844_v52  ;;  %v728_v30 = vmul.f32 %v3116_v1, %v3116_v1 }
 0x14f   : > { %v2261_v3 = vpop.eup %2260  ;;  %v832_v40 = vsel %vm831_vm10, %v2255_v26, %v828_v7  ;;  %v836_v10 = vmul.f32 0.5, %v835_v61  ;;  %vm839_vm11 = vweird.f32 %v3086_v23  ;;  %v544_v12 = vadd.f32 %v543_v28, %v3084_v37 }
 0x150   : > { %1212 = vmatmul.f32.gmra.mxu3 %v1134_v13  ;;  %v947_v63 = vmul.f32 %v832_v40, %v2835_v32  ;;  %v854_v2 = vmul.f32 %v2261_v3, %v3100_v36  ;;  %vm840_vm12 = vweird.f32 %v2257_v35  ;;  %v846_v43 = vmul.f32 0.5, %v845_v25 }
 0x151   : > { %v837_v62 = vsub.f32 1.5, %v836_v10  ;;  %2262 = vrsqrt.f32 %v3122_v6  ;;  %vm850_vm13 = vweird.f32 %v2259_v42  ;;  %v762_v17 = vmax.f32 %v746_v49, 0.0  ;;  %vm841_vm14 = vmor %vm839_vm11, %vm840_vm12 }
 0x152   : > { %v963_v26 = vmul.f32 %v947_v63, %v3019_v39  ;;  %v1011_v27 = vperm.slane %v947_v63, 0  ;;  %v855_v58 = vmul.f32 %v2261_v3, %v854_v2  ;;  %v847_v50 = vsub.f32 1.5, %v846_v43 }
 0x153   : > { %v838_v57 = vmul.f32 %v2257_v35, %v837_v62  ;;  %v744_v31 = vsub.f32 %v3033_v53, %v728_v30  ;;  %vm849_vm15 = vweird.f32 %v3088_v4  ;;  %vm859_vm0 = vweird.f32 %v3100_v36 }
 0x154   : > { %v979_v41 = vsub.f32 %v2864_v5, %v963_v26  ;;  %v3138_v37 = vmul.f32 0.125, %v544_v12  ;;  %v848_v28 = vmul.f32 %v2259_v42, %v847_v50  ;;  %v856_v56 = vmul.f32 0.5, %v855_v58  ;;  %vm851_vm1 = vmor %vm849_vm15, %vm850_vm13 }
 0x155   : > { %v842_v39 = vsel %vm841_vm14, %v2257_v35, %v838_v57  ;;  %v760_v16 = vmax.f32 %v744_v31, 0.0  ;;  %v1043_v8 = vmul.f32 %v1011_v27, %v2776_v24  ;;  %vm860_vm2 = vweird.f32 %v2261_v3 }
 0x156   : > { %v1075_v18 = vperm.slane %v979_v41, 0  ;;  %v948_v53 = vmul.f32 %v842_v39, %v2835_v32  ;;  %v3143_v51 = vadd.f32 0.0001, %v762_v17  ;;  %v852_v4 = vsel %vm851_vm1, %v2259_v42, %v848_v28  ;;  %vm861_vm3 = vmor %vm859_vm0, %vm860_vm2 }
 0x157   : > { %v2263_v23 = vpop.eup %2262  ;;  %v857_v29 = vsub.f32 1.5, %v856_v56  ;;  %v776_v19 = vadd.f32 0.0001, %v760_v16  ;;  %v949_v34 = vmul.f32 %v852_v4, %v2835_v32  ;;  %v729_v22 = vmul.f32 %v3138_v37, %v3138_v37 }
 0x158   : > { %v1107_v44 = vadd.f32 %v1075_v18, %v1043_v8  ;;  %v964_v35 = vmul.f32 %v948_v53, %v3035_v47  ;;  %v1012_v15 = vperm.slane %v948_v53, 0  ;;  %v864_v24 = vmul.f32 %v2263_v23, %v3122_v6 }
 0x159   : > { %v858_v38 = vmul.f32 %v2261_v3, %v857_v29  ;;  %2264 = vrsqrt.f32 %v776_v19  ;;  %v965_v42 = vmul.f32 %v949_v34, %v3037_v14  ;;  %v745_v40 = vsub.f32 %v3120_v48, %v729_v22 }
 0x15a   : > { %v1123_v59 = vmax.f32 %v1107_v44, 0.0  ;;  %v980_v60 = vsub.f32 %v2864_v5, %v964_v35  ;;  %2266 = vrsqrt.f32 %v3143_v51  ;;  %v1044_v47 = vmul.f32 %v1012_v15, %v2803_v0 }
 0x15b   : > { %v862_v7 = vsel %vm861_vm3, %v2261_v3, %v858_v38  ;;  %v981_v52 = vsub.f32 %v2864_v5, %v965_v42  ;;  %v865_v49 = vmul.f32 %v2263_v23, %v864_v24  ;;  %v1013_v14 = vperm.slane %v949_v34, 0 }
 0x15c   : > { %1179 = vmatmul.f32.gmra.mxu1 %v1123_v59  ;;  %v1076_v61 = vperm.slane %v980_v60, 0  ;;  %v950_v13 = vmul.f32 %v862_v7, %v2835_v32  ;;  %v761_v36 = vmax.f32 %v745_v40, 0.0  ;;  %vm870_vm4 = vweird.f32 %v2263_v23 }
 0x15d   : > { %v866_v30 = vmul.f32 0.5, %v865_v49  ;;  %v1077_v2 = vperm.slane %v981_v52, 0  ;;  %v1045_v43 = vmul.f32 %v1013_v14, %v2844_v46  ;;  %vm869_vm5 = vweird.f32 %v3122_v6 }
 0x15e   : > { %v1108_v10 = vadd.f32 %v1076_v61, %v1044_v47  ;;  %v966_v12 = vmul.f32 %v950_v13, %v3039_v9  ;;  %v777_v26 = vadd.f32 0.0001, %v761_v36  ;;  %vm871_vm6 = vmor %vm869_vm5, %vm870_vm4  ;;  %v1014_v31 = vperm.slane %v950_v13, 0 }
 0x15f   : > { %v2265_v25 = vpop.eup %2264  ;;  %v867_v3 = vsub.f32 1.5, %v866_v30  ;;  %v1109_v58 = vadd.f32 %v1077_v2, %v1045_v43  ;;  %vm879_vm8 = vweird.f32 %v776_v19  ;;  %vm899_vm14 = vweird.f32 %v3143_v51 }
 0x160   : > { %v1124_v63 = vmax.f32 %v1108_v10, 0.0  ;;  %v3161_v0 = vpop.eup %2266  ;;  %v874_v62 = vmul.f32 %v2265_v25, %v776_v19  ;;  %v982_v17 = vsub.f32 %v2864_v5, %v966_v12  ;;  %2268 = vrsqrt.f32 %v777_v26 }
 0x161   : > { %v868_v27 = vmul.f32 %v2263_v23, %v867_v3  ;;  %v894_v9 = vmul.f32 %v3161_v0, %v3143_v51  ;;  %vm880_vm7 = vweird.f32 %v2265_v25  ;;  %v1125_v39 = vmax.f32 %v1109_v58, 0.0 }
 0x162   : > { %v875_v48 = vmul.f32 %v2265_v25, %v874_v62  ;;  %v1078_v28 = vperm.slane %v982_v17, 0  ;;  %v1046_v18 = vmul.f32 %v1014_v31, %v2882_v33  ;;  %vm881_vm9 = vmor %vm879_vm8, %vm880_vm7  ;;  %vm889_vm11 = vweird.f32 %v777_v26 }
 0x163   : > { %v872_v57 = vsel %vm871_vm6, %v2263_v23, %v868_v27  ;;  %v895_v56 = vmul.f32 %v3161_v0, %v894_v9  ;;  %vm900_vm13 = vweird.f32 %v3161_v0 }
 0x164   : > { %1182 = vmatmul.f32.gmra.mxu1 %v1124_v63  ;;  %v876_v50 = vmul.f32 0.5, %v875_v48  ;;  %v951_v41 = vmul.f32 %v872_v57, %v2835_v32  ;;  %v1110_v4 = vadd.f32 %v1078_v28, %v1046_v18  ;;  %vm901_vm15 = vmor %vm899_vm14, %vm900_vm13 }
 0x165   : > { %v896_v35 = vmul.f32 0.5, %v895_v56 }
 0x166   : > { %v877_v46 = vsub.f32 1.5, %v876_v50  ;;  %v967_v6 = vmul.f32 %v951_v41, %v3094_v11  ;;  %v2269_v8 = vpop.eup %2268  ;;  %v1015_v34 = vperm.slane %v951_v41, 0  ;;  %v1126_v38 = vmax.f32 %v1110_v4, 0.0 }
 0x167   : > { %v884_v23 = vmul.f32 %v2269_v8, %v777_v26  ;;  %v897_v22 = vsub.f32 1.5, %v896_v35  ;;  %vm890_vm10 = vweird.f32 %v2269_v8 }
 0x168   : > { %v878_v16 = vmul.f32 %v2265_v25, %v877_v46  ;;  %v983_v29 = vsub.f32 %v2864_v5, %v967_v6  ;;  %v1047_v33 = vmul.f32 %v1015_v34, %v2908_v45  ;;  %vm891_vm12 = vmor %vm889_vm11, %vm890_vm10 }
 0x169   : > { %v885_v15 = vmul.f32 %v2269_v8, %v884_v23  ;;  %v898_v7 = vmul.f32 %v3161_v0, %v897_v22 }
 0x16a   : > { %v882_v53 = vsel %vm881_vm9, %v2265_v25, %v878_v16  ;;  %v1079_v24 = vperm.slane %v983_v29, 0 }
 0x16b   : > { %v952_v44 = vmul.f32 %v882_v53, %v2835_v32  ;;  %v886_v11 = vmul.f32 0.5, %v885_v15  ;;  %v902_v40 = vsel %vm901_vm15, %v3161_v0, %v898_v7 }
 0x16c   : > { %1185 = vmatmul.f32.gmra.mxu1 %v1125_v39  ;;  %v1111_v42 = vadd.f32 %v1079_v24, %v1047_v33  ;;  %v954_v14 = vmul.f32 %v902_v40, %v2835_v32 }
 0x16d   : > { %v968_v19 = vmul.f32 %v952_v44, %v3116_v1  ;;  %v887_v59 = vsub.f32 1.5, %v886_v11  ;;  %v1016_v52 = vperm.slane %v952_v44, 0 }
 0x16e   : > { %v1127_v13 = vmax.f32 %v1111_v42, 0.0  ;;  %v970_v51 = vmul.f32 %v954_v14, %v3106_v21  ;;  %v1018_v0 = vperm.slane %v954_v14, 0 }
 0x16f   : > { %v888_v60 = vmul.f32 %v2269_v8, %v887_v59  ;;  %v984_v47 = vsub.f32 %v2864_v5, %v968_v19  ;;  %v1048_v10 = vmul.f32 %v1016_v52, %v2939_v20 }
 0x171   : > { %v892_v61 = vsel %vm891_vm12, %v2269_v8, %v888_v60  ;;  %v1080_v45 = vperm.slane %v984_v47, 0  ;;  %v1887_v60 = vld [vmem:[#allocation8 + $0x78] sm:$0xff] }
 0x172   : > { %v953_v1 = vmul.f32 %v892_v61, %v2835_v32  ;;  %v1050_v32 = vmul.f32 %v1018_v0, %v3057_v54  ;;  %1888 = vmatpush.msra.mxu2 %v1887_v60  ;;  %2141 = vmatpush.msra.mxu3 %v1887_v60 }
 0x173   : > { %v1112_v25 = vadd.f32 %v1080_v45, %v1048_v10 }
 0x174   : > { %1188 = vmatmul.f32.gmra.mxu1 %v1126_v38  ;;  %v969_v49 = vmul.f32 %v953_v1, %v3138_v37  ;;  %v1017_v36 = vperm.slane %v953_v1, 0  ;;  %v986_v37 = vsub.f32 %v2864_v5, %v970_v51 }
 0x175   : > { %v1128_v63 = vmax.f32 %v1112_v25, 0.0 }
 0x176   : > { %v985_v30 = vsub.f32 %v2864_v5, %v969_v49  ;;  %v1049_v12 = vmul.f32 %v1017_v36, %v2972_v55  ;;  %v1082_v20 = vperm.slane %v986_v37, 0 }
 0x178   : > { %v1081_v2 = vperm.slane %v985_v30, 0  ;;  %v1114_v43 = vadd.f32 %v1082_v20, %v1050_v32 }
 0x17a   : > { %v1113_v3 = vadd.f32 %v1081_v2, %v1049_v12  ;;  %v1130_v26 = vmax.f32 %v1114_v43, 0.0  ;;  %v1886_v2 = vld [vmem:[#allocation8 + $0x70] sm:$0xff] }
 0x17b   : > { %1889 = vmatpush.msra.mxu2 %v1886_v2  ;;  %2142 = vmatpush.msra.mxu3 %v1886_v2 }
 0x17c   : > { %1191 = vmatmul.f32.gmra.mxu1 %v1127_v13  ;;  %v1129_v62 = vmax.f32 %v1113_v3, 0.0  ;;  %v1885_v3 = vld [vmem:[#allocation8 + $0x68] sm:$0xff] }
 0x17d   : > { %1890 = vmatpush.msra.mxu2 %v1885_v3  ;;  %2143 = vmatpush.msra.mxu3 %v1885_v3 }
 0x184   : > { %1194 = vmatmul.f32.gmra.mxu1 %v1128_v63 }
 0x18c   : > { %1197 = vmatmul.f32.gmra.mxu1 %v1129_v62  ;;  %v1884_v62 = vld [vmem:[#allocation8 + $0x60] sm:$0xff] }
 0x18d   : > { %1891 = vmatpush.msra.mxu2 %v1884_v62  ;;  %2144 = vmatpush.msra.mxu3 %v1884_v62 }
 0x193   : > { %v3190_v27 = vpop.f32.mrf.mxu1 }
 0x194   : > { %1200 = vmatmul.f32.gmra.mxu1 %v1130_v26  ;;  %v1216_v48 = vrot.slane %v3190_v27, 4  ;;  %v1312_v55 = vmul.f32 %v3190_v27, %v3190_v27  ;;  %v1883_v26 = vld [vmem:[#allocation8 + $0x58] sm:$0xff] }
 0x195   : > { %1892 = vmatpush.msra.mxu2 %v1883_v26  ;;  %2145 = vmatpush.msra.mxu3 %v1883_v26 }
 0x196   : > { %v1217_v21 = vadd.f32 %v1216_v48, %v3190_v27  ;;  %v1328_v58 = vrot.slane %v1312_v55, 4  ;;  %v3196_v5 = vpop.f32.mrf.mxu3 }
 0x197   : > { %v1288_v17 = vrot.slane %v3196_v5, 4  ;;  %v1324_v54 = vmul.f32 %v3196_v5, %v3196_v5 }
 0x198   : > { %v1329_v9 = vadd.f32 %v1328_v58, %v1312_v55  ;;  %v1218_v57 = vrot.slane %v1217_v21, 2 }
 0x199   : > { %v1289_v50 = vadd.f32 %v1288_v17, %v3196_v5  ;;  %v1400_v31 = vrot.slane %v1324_v54, 4 }
 0x19a   : > { %v1330_v41 = vrot.slane %v1329_v9, 2  ;;  %v1219_v6 = vadd.f32 %v1218_v57, %v1217_v21 }
 0x19b   : > { %v1290_v46 = vrot.slane %v1289_v50, 2  ;;  %v1401_v39 = vadd.f32 %v1400_v31, %v1324_v54 }
 0x19c   : > { %v1331_v28 = vadd.f32 %v1330_v41, %v1329_v9  ;;  %v1220_v23 = vrot.slane %v1219_v6, 1 }
 0x19d   : > { %v1291_v56 = vadd.f32 %v1290_v46, %v1289_v50  ;;  %v1402_v16 = vrot.slane %v1401_v39, 2 }
 0x19e   : > { %v1332_v8 = vrot.slane %v1331_v28, 1  ;;  %v1221_v24 = vadd.f32 %v1220_v23, %v1219_v6  ;;  %v1882_v6 = vld [vmem:[#allocation8 + $0x50] sm:$0xff] }
 0x19f   : > { %v1292_v18 = vrot.slane %v1291_v56, 1  ;;  %v1403_v53 = vadd.f32 %v1402_v16, %v1401_v39  ;;  %1893 = vmatpush.msra.mxu2 %v1882_v6  ;;  %2146 = vmatpush.msra.mxu3 %v1882_v6 }
 0x1a0   : > { %v1333_v44 = vadd.f32 %v1332_v8, %v1331_v28  ;;  %v3211_v42 = vmul.f32 0.125, %v1221_v24 }
 0x1a1   : > { %v1293_v4 = vadd.f32 %v1292_v18, %v1291_v56  ;;  %v1404_v29 = vrot.slane %v1403_v53, 1 }
 0x1a2   : > { %v1440_v59 = vmul.f32 0.125, %v1333_v44  ;;  %v1456_v52 = vmul.f32 %v3211_v42, %v3211_v42 }
 0x1a3   : > { %v1405_v35 = vadd.f32 %v1404_v29, %v1403_v53  ;;  %v3202_v15 = vmul.f32 0.125, %v1293_v4  ;;  %v1881_v29 = vld [vmem:[#allocation8 + $0x48] sm:$0xff] }
 0x1a4   : > { %v3204_v34 = vpop.f32.mrf.mxu1  ;;  %v1472_v49 = vsub.f32 %v1440_v59, %v1456_v52  ;;  %1894 = vmatpush.msra.mxu2 %v1881_v29  ;;  %2147 = vmatpush.msra.mxu3 %v1881_v29  ;;  %v1880_v59 = vld [vmem:[#allocation8 + $0x40] sm:$0xff] }
 0x1a5   : > { %v1452_v11 = vmul.f32 0.125, %v1405_v35  ;;  %v1468_v38 = vmul.f32 %v3202_v15, %v3202_v15  ;;  %v1222_v19 = vrot.slane %v3204_v34, 4  ;;  %v1313_v22 = vmul.f32 %v3204_v34, %v3204_v34 }
 0x1a6   : > { %v1488_v14 = vmax.f32 %v1472_v49, 0.0  ;;  %1895 = vmatpush.msra.mxu2 %v1880_v59  ;;  %2148 = vmatpush.msra.mxu3 %v1880_v59 }
 0x1a7   : > { %v1484_v33 = vsub.f32 %v1452_v11, %v1468_v38  ;;  %v1223_v47 = vadd.f32 %v1222_v19, %v3204_v34  ;;  %v1334_v7 = vrot.slane %v1313_v22, 4 }
 0x1a8   : > { %v3219_v36 = vadd.f32 0.0001, %v1488_v14 }
 0x1a9   : > { %v1500_v61 = vmax.f32 %v1484_v33, 0.0  ;;  %v1224_v1 = vrot.slane %v1223_v47, 2  ;;  %v1335_v13 = vadd.f32 %v1334_v7, %v1313_v22  ;;  %v3260_v7 = vld [vmem:[%s3649_s5] sm:$0x1] }
 0x1aa   : > { %vm1526_vm4 = vweird.f32 %v3219_v36 }
 0x1ab   : > { %v3216_v45 = vadd.f32 0.0001, %v1500_v61  ;;  %v1225_v40 = vadd.f32 %v1224_v1, %v1223_v47  ;;  %v1336_v10 = vrot.slane %v1335_v13, 2 }
 0x1ad   : > { %2270 = vrsqrt.f32 %v3216_v45  ;;  %v1226_v25 = vrot.slane %v1225_v40, 1  ;;  %v1337_v30 = vadd.f32 %v1336_v10, %v1335_v13  ;;  %vm1646_vm1 = vweird.f32 %v3216_v45  ;;  %v1879_v13 = vld [vmem:[#allocation8 + $0x38] sm:$0xff] }
 0x1ae   : > { %2272 = vrsqrt.f32 %v3219_v36  ;;  %1896 = vmatpush.msra.mxu2 %v1879_v13  ;;  %2149 = vmatpush.msra.mxu3 %v1879_v13 }
 0x1af   : > { %v1338_v63 = vrot.slane %v1337_v30, 1  ;;  %v1227_v51 = vadd.f32 %v1226_v25, %v1225_v40 }
 0x1b1   : > { %v1339_v12 = vadd.f32 %v1338_v63, %v1337_v30  ;;  %v3222_v37 = vmul.f32 0.125, %v1227_v51  ;;  %v1878_v51 = vld [vmem:[#allocation8 + $0x30] sm:$0xff] }
 0x1b2   : > { %1897 = vmatpush.msra.mxu2 %v1878_v51  ;;  %2150 = vmatpush.msra.mxu3 %v1878_v51 }
 0x1b3   : > { %v3224_v0 = vpop.eup %2270  ;;  %v1441_v20 = vmul.f32 0.125, %v1339_v12  ;;  %v3228_v43 = vpop.f32.mrf.mxu1  ;;  %v1457_v48 = vmul.f32 %v3222_v37, %v3222_v37 }
 0x1b4   : > { %v1641_v32 = vmul.f32 %v3224_v0, %v3216_v45  ;;  %v1228_v55 = vrot.slane %v3228_v43, 4  ;;  %v1314_v21 = vmul.f32 %v3228_v43, %v3228_v43  ;;  %v3241_v50 = vpop.eup %2272  ;;  %vm1647_vm0 = vweird.f32 %v3224_v0 }
 0x1b5   : > { %v3235_v58 = vpop.f32.mrf.mxu3  ;;  %v1473_v57 = vsub.f32 %v1441_v20, %v1457_v48  ;;  %v1521_v56 = vmul.f32 %v3241_v50, %v3219_v36  ;;  %vm1648_vm2 = vmor %vm1646_vm1, %vm1647_vm0  ;;  %vm1527_vm3 = vweird.f32 %v3241_v50  ;;  %v3281_v36 = vld [vmem:[%s3650_s6] sm:$0x1]  ;;  %v1877_v20 = vld [vmem:[#allocation8 + $0x28] sm:$0xff] }
 0x1b6   : > { %v1642_v17 = vmul.f32 %v3224_v0, %v1641_v32  ;;  %v1294_v54 = vrot.slane %v3235_v58, 4  ;;  %v1325_v9 = vmul.f32 %v3235_v58, %v3235_v58  ;;  %v1229_v31 = vadd.f32 %v1228_v55, %v3228_v43  ;;  %vm1528_vm5 = vmor %vm1526_vm4, %vm1527_vm3  ;;  %1898 = vmatpush.msra.mxu2 %v1877_v20  ;;  %2151 = vmatpush.msra.mxu3 %v1877_v20 }
 0x1b7   : > { %v1340_v41 = vrot.slane %v1314_v21, 4  ;;  %v1489_v18 = vmax.f32 %v1473_v57, 0.0  ;;  %v1522_v44 = vmul.f32 %v3241_v50, %v1521_v56 }
 0x1b8   : > { %v1643_v46 = vmul.f32 0.5, %v1642_v17  ;;  %v1295_v39 = vadd.f32 %v1294_v54, %v3235_v58  ;;  %v1406_v28 = vrot.slane %v1325_v9, 4  ;;  %v1230_v16 = vrot.slane %v1229_v31, 2 }
 0x1b9   : > { %v1341_v8 = vadd.f32 %v1340_v41, %v1314_v21  ;;  %v3250_v38 = vadd.f32 0.0001, %v1489_v18  ;;  %v1523_v33 = vmul.f32 0.5, %v1522_v44  ;;  %v1876_v41 = vld [vmem:[#allocation8 + $0x20] sm:$0xff] }
 0x1ba   : > { %v1644_v53 = vsub.f32 1.5, %v1643_v46  ;;  %v1296_v23 = vrot.slane %v1295_v39, 2  ;;  %v1407_v4 = vadd.f32 %v1406_v28, %v1325_v9  ;;  %v1231_v35 = vadd.f32 %v1230_v16, %v1229_v31  ;;  %1899 = vmatpush.msra.mxu2 %v1876_v41  ;;  %2152 = vmatpush.msra.mxu3 %v1876_v41 }
 0x1bb   : > { %v1342_v11 = vrot.slane %v1341_v8, 2  ;;  %2274 = vrsqrt.f32 %v3250_v38  ;;  %v1524_v45 = vsub.f32 1.5, %v1523_v33  ;;  %vm1536_vm6 = vweird.f32 %v3250_v38 }
 0x1bc   : > { %v1645_v24 = vmul.f32 %v3224_v0, %v1644_v53  ;;  %v1297_v19 = vadd.f32 %v1296_v23, %v1295_v39  ;;  %v1408_v22 = vrot.slane %v1407_v4, 2  ;;  %v1232_v60 = vrot.slane %v1231_v35, 1  ;;  %v1875_v53 = vld [vmem:[#allocation8 + $0x18] sm:$0xff] }
 0x1bd   : > { %v1343_v47 = vadd.f32 %v1342_v11, %v1341_v8  ;;  %v1525_v25 = vmul.f32 %v3241_v50, %v1524_v45  ;;  %1900 = vmatpush.msra.mxu2 %v1875_v53  ;;  %2153 = vmatpush.msra.mxu3 %v1875_v53 }
 0x1be   : > { %v1649_v61 = vsel %vm1648_vm2, %v3224_v0, %v1645_v24  ;;  %v1298_v52 = vrot.slane %v1297_v19, 1  ;;  %v1409_v1 = vadd.f32 %v1408_v22, %v1407_v4  ;;  %v1233_v10 = vadd.f32 %v1232_v60, %v1231_v35  ;;  %v1874_v24 = vld [vmem:[#allocation8 + $0x10] sm:$0xff] }
 0x1bf   : > { %v3264_v49 = vmul.f32 %v1649_v61, %v3260_v7  ;;  %v1344_v40 = vrot.slane %v1343_v47, 1  ;;  %v1529_v3 = vsel %vm1528_vm5, %v3241_v50, %v1525_v25  ;;  %1901 = vmatpush.msra.mxu2 %v1874_v24  ;;  %2154 = vmatpush.msra.mxu3 %v1874_v24 }
 0x1c0   : > { %v1410_v14 = vrot.slane %v1409_v1, 1  ;;  %v1299_v30 = vadd.f32 %v1298_v52, %v1297_v19  ;;  %v1680_v32 = vmul.f32 %v1529_v3, %v3260_v7  ;;  %v3286_v26 = vmul.f32 0.125, %v1233_v10  ;;  %v1873_v52 = vld [vmem:[#allocation8 + $0x8] sm:$0xff] }
 0x1c1   : > { %v3270_v63 = vmul.f32 %v3264_v49, %v3202_v15  ;;  %v1345_v2 = vadd.f32 %v1344_v40, %v1343_v47  ;;  %v1756_v12 = vperm.slane %v3264_v49, 0  ;;  %v3276_v0 = vpop.eup %2274  ;;  %1902 = vmatpush.msra.mxu2 %v1873_v52  ;;  %2155 = vmatpush.msra.mxu3 %v1873_v52 }
 0x1c2   : > { %v1411_v15 = vadd.f32 %v1410_v14, %v1409_v1  ;;  %v3288_v48 = vmul.f32 0.125, %v1299_v30  ;;  %v1531_v9 = vmul.f32 %v3276_v0, %v3250_v38  ;;  %v1696_v46 = vmul.f32 %v1680_v32, %v3211_v42  ;;  %v1872_v30 = vld [vmem:[#allocation8] sm:$0xff] }
 0x1c3   : > { %v3283_v62 = vpop.f32.mrf.mxu3  ;;  %v1724_v55 = vsub.f32 %v3281_v36, %v3270_v63  ;;  %v1442_v57 = vmul.f32 0.125, %v1345_v2  ;;  %v1744_v6 = vperm.slane %v1680_v32, 0  ;;  %vm1537_vm7 = vweird.f32 %v3276_v0  ;;  %1903 = vmatpush.msra.mxu2 %v1872_v30  ;;  %2156 = vmatpush.msra.mxu3 %v1872_v30 }
 0x1c4   : > { %v3292_v21 = vpop.f32.mrf.mxu1  ;;  %v1300_v17 = vrot.slane %v3283_v62, 4  ;;  %v1326_v54 = vmul.f32 %v3283_v62, %v3283_v62  ;;  %v1532_v56 = vmul.f32 %v3276_v0, %v1531_v9  ;;  %v1453_v16 = vmul.f32 0.125, %v1411_v15  ;;  %vm1538_vm8 = vmor %vm1536_vm6, %vm1537_vm7 }
 0x1c5   : > { %v1234_v50 = vrot.slane %v3292_v21, 4  ;;  %v1315_v31 = vmul.f32 %v3292_v21, %v3292_v21  ;;  %v1712_v23 = vsub.f32 %v3281_v36, %v1696_v46  ;;  %v1776_v42 = vmul.f32 %v1744_v6, %v3190_v27 }
 0x1c6   : > { %v1301_v39 = vadd.f32 %v1300_v17, %v3283_v62  ;;  %v1412_v28 = vrot.slane %v1326_v54, 4  ;;  %v1533_v44 = vmul.f32 0.5, %v1532_v56  ;;  %v1458_v60 = vmul.f32 %v3286_v26, %v3286_v26 }
 0x1c7   : > { %v1235_v8 = vadd.f32 %v1234_v50, %v3292_v21  ;;  %v1346_v18 = vrot.slane %v1315_v31, 4  ;;  %v1808_v19 = vperm.slane %v1712_v23, 0  ;;  %v1469_v1 = vmul.f32 %v3288_v48, %v3288_v48 }
 0x1c8   : > { %v1302_v4 = vrot.slane %v1301_v39, 2  ;;  %v1413_v29 = vadd.f32 %v1412_v28, %v1326_v54  ;;  %v1534_v33 = vsub.f32 1.5, %v1533_v44  ;;  %v1474_v10 = vsub.f32 %v1442_v57, %v1458_v60 }
 0x1c9   : > { %v1236_v35 = vrot.slane %v1235_v8, 2  ;;  %v1347_v11 = vadd.f32 %v1346_v18, %v1315_v31  ;;  %v1840_v27 = vadd.f32 %v1808_v19, %v1776_v42  ;;  %v1485_v51 = vsub.f32 %v1453_v16, %v1469_v1 }
 0x1ca   : > { %v1303_v22 = vadd.f32 %v1302_v4, %v1301_v39  ;;  %v1414_v59 = vrot.slane %v1413_v29, 2  ;;  %v1535_v40 = vmul.f32 %v3276_v0, %v1534_v33  ;;  %v1490_v20 = vmax.f32 %v1474_v10, 0.0 }
 0x1cb   : > { %v1237_v47 = vadd.f32 %v1236_v35, %v1235_v8  ;;  %v1348_v61 = vrot.slane %v1347_v11, 2  ;;  %v1856_v2 = vmax.f32 %v1840_v27, 0.0  ;;  %v1501_v9 = vmax.f32 %v1485_v51, 0.0 }
 0x1cc   : > { %v1304_v13 = vrot.slane %v1303_v22, 1  ;;  %v1415_v45 = vadd.f32 %v1414_v59, %v1413_v29  ;;  %v1539_v15 = vsel %vm1538_vm8, %v3276_v0, %v1535_v40  ;;  %v1820_v50 = vperm.slane %v1724_v55, 0 }
 0x1cd   : > { %v1238_v14 = vrot.slane %v1237_v47, 1  ;;  %v1349_v25 = vadd.f32 %v1348_v61, %v1347_v11  ;;  %1904 = vmatmul.f32.vlgmr.msra.gmra.mxu2 %v1856_v2  ;;  %v1681_v54 = vmul.f32 %v1539_v15, %v3260_v7  ;;  %v3324_v31 = vadd.f32 0.0001, %v1490_v20 }
 0x1ce   : > { %v1416_v3 = vrot.slane %v1415_v45, 1  ;;  %v1305_v32 = vadd.f32 %v1304_v13, %v1303_v22  ;;  %v3329_v28 = vadd.f32 0.0001, %v1501_v9  ;;  %v1788_v6 = vmul.f32 %v1756_v12, %v3196_v5 }
 0x1cf   : > { %v1350_v17 = vrot.slane %v1349_v25, 1  ;;  %v1239_v57 = vadd.f32 %v1238_v14, %v1237_v47  ;;  %v1697_v0 = vmul.f32 %v1681_v54, %v3222_v37  ;;  %v1745_v39 = vperm.slane %v1681_v54, 0 }
 0x1d0   : > { %v1417_v38 = vadd.f32 %v1416_v3, %v1415_v45  ;;  %v3326_v41 = vmul.f32 0.125, %v1305_v32  ;;  %2276 = vrsqrt.f32 %v3324_v31  ;;  %v1852_v8 = vadd.f32 %v1820_v50, %v1788_v6 }
 0x1d1   : > { %v1351_v46 = vadd.f32 %v1350_v17, %v1349_v25  ;;  %v3335_v56 = vmul.f32 0.125, %v1239_v57  ;;  %v1713_v16 = vsub.f32 %v3281_v36, %v1697_v0  ;;  %2278 = vrsqrt.f32 %v3329_v28 }
 0x1d2   : > { %v1454_v49 = vmul.f32 0.125, %v1417_v38  ;;  %v1777_v12 = vmul.f32 %v1745_v39, %v3204_v34  ;;  %v1470_v23 = vmul.f32 %v3326_v41, %v3326_v41  ;;  %v1868_v60 = vmax.f32 %v1852_v8, 0.0 }
 0x1d3   : > { %v1443_v63 = vmul.f32 0.125, %v1351_v46  ;;  %v3337_v55 = vpop.f32.mrf.mxu3  ;;  %v1459_v5 = vmul.f32 %v3335_v56, %v3335_v56  ;;  %v1809_v53 = vperm.slane %v1713_v16, 0  ;;  %vm1546_vm10 = vweird.f32 %v3324_v31 }
 0x1d4   : > { %v1306_v37 = vrot.slane %v3337_v55, 4  ;;  %v1327_v18 = vmul.f32 %v3337_v55, %v3337_v55  ;;  %v1486_v47 = vsub.f32 %v1454_v49, %v1470_v23  ;;  %1940 = vmatmul.f32.vlgmr.msra.gmra.mxu3 %v1868_v60  ;;  %vm1656_vm11 = vweird.f32 %v3329_v28 }
 0x1d5   : > { %v1475_v42 = vsub.f32 %v1443_v63, %v1459_v5  ;;  %v1841_v44 = vadd.f32 %v1809_v53, %v1777_v12 }
 0x1d6   : > { %v1307_v4 = vadd.f32 %v1306_v37, %v3337_v55  ;;  %v1418_v29 = vrot.slane %v1327_v18, 4  ;;  %v2277_v35 = vpop.eup %2276  ;;  %v1502_v20 = vmax.f32 %v1486_v47, 0.0 }
 0x1d7   : > { %v1491_v19 = vmax.f32 %v1475_v42, 0.0  ;;  %v2279_v22 = vpop.eup %2278  ;;  %v1857_v33 = vmax.f32 %v1841_v44, 0.0  ;;  %v1541_v34 = vmul.f32 %v2277_v35, %v3324_v31  ;;  %vm1547_vm9 = vweird.f32 %v2277_v35 }
 0x1d8   : > { %v1308_v11 = vrot.slane %v1307_v4, 2  ;;  %v1419_v24 = vadd.f32 %v1418_v29, %v1327_v18  ;;  %v1651_v45 = vmul.f32 %v2279_v22, %v3329_v28  ;;  %v3362_v57 = vadd.f32 0.0001, %v1502_v20  ;;  %vm1548_vm13 = vmor %vm1546_vm10, %vm1547_vm9 }
 0x1d9   : > { %v3350_v59 = vpop.f32.mrf.mxu1  ;;  %1907 = vmatmul.f32.gmra.mxu2 %v1857_v33  ;;  %v1542_v13 = vmul.f32 %v2277_v35, %v1541_v34  ;;  %v3357_v40 = vadd.f32 0.0001, %v1491_v19  ;;  %vm1657_vm12 = vweird.f32 %v2279_v22 }
 0x1da   : > { %v1240_v61 = vrot.slane %v3350_v59, 4  ;;  %v1316_v52 = vmul.f32 %v3350_v59, %v3350_v59  ;;  %v1309_v27 = vadd.f32 %v1308_v11, %v1307_v4  ;;  %v1420_v1 = vrot.slane %v1419_v24, 2  ;;  %vm1658_vm14 = vmor %vm1656_vm11, %vm1657_vm12 }
 0x1db   : > { %v1543_v30 = vmul.f32 0.5, %v1542_v13  ;;  %v1652_v2 = vmul.f32 %v2279_v22, %v1651_v45  ;;  %2280 = vrsqrt.f32 %v3357_v40  ;;  %vm1556_vm15 = vweird.f32 %v3357_v40 }
 0x1dc   : > { %v1241_v10 = vadd.f32 %v1240_v61, %v3350_v59  ;;  %v1352_v14 = vrot.slane %v1316_v52, 4  ;;  %v1421_v25 = vadd.f32 %v1420_v1, %v1419_v24  ;;  %v1310_v15 = vrot.slane %v1309_v27, 1 }
 0x1dd   : > { %v1544_v32 = vsub.f32 1.5, %v1543_v30  ;;  %v1653_v17 = vmul.f32 0.5, %v1652_v2  ;;  %2282 = vrsqrt.f32 %v3362_v57  ;;  %vm1666_vm1 = vweird.f32 %v3362_v57 }
 0x1de   : > { %v1242_v51 = vrot.slane %v1241_v10, 2  ;;  %v1353_v3 = vadd.f32 %v1352_v14, %v1316_v52  ;;  %v1422_v9 = vrot.slane %v1421_v25, 1  ;;  %v1311_v63 = vadd.f32 %v1310_v15, %v1309_v27 }
 0x1df   : > { %v1545_v38 = vmul.f32 %v2277_v35, %v1544_v32  ;;  %v1654_v46 = vsub.f32 1.5, %v1653_v17 }
 0x1e0   : > { %v1354_v54 = vrot.slane %v1353_v3, 2  ;;  %v1243_v0 = vadd.f32 %v1242_v51, %v1241_v10  ;;  %v1423_v5 = vadd.f32 %v1422_v9, %v1421_v25  ;;  %v3377_v44 = vmul.f32 0.125, %v1311_v63 }
 0x1e1   : > { %v3364_v50 = vpop.f32.mrf.mxu1  ;;  %v2281_v16 = vpop.eup %2280  ;;  %v1549_v31 = vsel %vm1548_vm13, %v2277_v35, %v1545_v38  ;;  %v1655_v37 = vmul.f32 %v2279_v22, %v1654_v46 }
 0x1e2   : > { %v1355_v39 = vadd.f32 %v1354_v54, %v1353_v3  ;;  %v1246_v6 = vrot.slane %v3364_v50, 4  ;;  %v1317_v8 = vmul.f32 %v3364_v50, %v3364_v50  ;;  %v1682_v49 = vmul.f32 %v1549_v31, %v3260_v7 }
 0x1e3   : > { %v1551_v12 = vmul.f32 %v2281_v16, %v3357_v40  ;;  %v1659_v23 = vsel %vm1658_vm14, %v2279_v22, %v1655_v37  ;;  %v1244_v4 = vrot.slane %v1243_v0, 1  ;;  %v3381_v33 = vmul.f32 0.125, %v1423_v5  ;;  %v3384_v22 = vpop.eup %2282 }
 0x1e4   : > { %v1356_v18 = vrot.slane %v1355_v39, 1  ;;  %v1358_v53 = vrot.slane %v1317_v8, 4  ;;  %v1698_v29 = vmul.f32 %v1682_v49, %v3286_v26  ;;  %v1746_v42 = vperm.slane %v1682_v49, 0 }
 0x1e5   : > { %v1247_v35 = vadd.f32 %v1246_v6, %v3364_v50  ;;  %v1693_v24 = vmul.f32 %v1659_v23, %v3260_v7  ;;  %v1552_v19 = vmul.f32 %v2281_v16, %v1551_v12  ;;  %vm1557_vm0 = vweird.f32 %v2281_v16 }
 0x1e6   : > { %v1359_v11 = vadd.f32 %v1358_v53, %v1317_v8  ;;  %v1357_v28 = vadd.f32 %v1356_v18, %v1355_v39  ;;  %v1714_v60 = vsub.f32 %v3281_v36, %v1698_v29  ;;  %v1778_v13 = vmul.f32 %v1746_v42, %v3228_v43  ;;  %vm1558_vm2 = vmor %vm1556_vm15, %vm1557_vm0 }
 0x1e7   : > { %v1709_v26 = vmul.f32 %v1693_v24, %v3288_v48  ;;  %v1757_v61 = vperm.slane %v1693_v24, 0  ;;  %v1553_v52 = vmul.f32 0.5, %v1552_v19  ;;  %v1248_v10 = vrot.slane %v1247_v35, 2 }
 0x1e8   : > { %v1360_v34 = vrot.slane %v1359_v11, 2  ;;  %v1810_v45 = vperm.slane %v1714_v60, 0  ;;  %v1245_v30 = vadd.f32 %v1244_v4, %v1243_v0  ;;  %v1661_v48 = vmul.f32 %v3384_v22, %v3362_v57 }
 0x1e9   : > { %v3386_v47 = vpop.f32.mrf.mxu1  ;;  %v1725_v14 = vsub.f32 %v3281_v36, %v1709_v26  ;;  %v1554_v25 = vsub.f32 1.5, %v1553_v52  ;;  %v1789_v20 = vmul.f32 %v1757_v61, %v3235_v58  ;;  %v1444_v46 = vmul.f32 0.125, %v1357_v28 }
 0x1ea   : > { %v1252_v27 = vrot.slane %v3386_v47, 4  ;;  %v1318_v1 = vmul.f32 %v3386_v47, %v3386_v47  ;;  %v1842_v3 = vadd.f32 %v1810_v45, %v1778_v13  ;;  %v1361_v15 = vadd.f32 %v1360_v34, %v1359_v11 }
 0x1eb   : > { %v1821_v32 = vperm.slane %v1725_v14, 0  ;;  %v1555_v17 = vmul.f32 %v2281_v16, %v1554_v25  ;;  %v1662_v38 = vmul.f32 %v3384_v22, %v1661_v48  ;;  %v3403_v6 = vmul.f32 0.125, %v1245_v30 }
 0x1ec   : > { %v1253_v2 = vadd.f32 %v1252_v27, %v3386_v47  ;;  %v1364_v51 = vrot.slane %v1318_v1, 4  ;;  %v1858_v9 = vmax.f32 %v1842_v3, 0.0  ;;  %v1249_v63 = vadd.f32 %v1248_v10, %v1247_v35 }
 0x1ed   : > { %v1853_v0 = vadd.f32 %v1821_v32, %v1789_v20  ;;  %v1559_v39 = vsel %vm1558_vm2, %v2281_v16, %v1555_v17  ;;  %v1663_v31 = vmul.f32 0.5, %v1662_v38  ;;  %v1362_v37 = vrot.slane %v1361_v15, 1 }
 0x1ee   : > { %v1254_v43 = vrot.slane %v1253_v2, 2  ;;  %v1365_v54 = vadd.f32 %v1364_v51, %v1318_v1  ;;  %1910 = vmatmul.f32.gmra.mxu2 %v1858_v9  ;;  %v1683_v8 = vmul.f32 %v1559_v39, %v3260_v7  ;;  %v1460_v40 = vmul.f32 %v3403_v6, %v3403_v6 }
 0x1ef   : > { %v1869_v5 = vmax.f32 %v1853_v0, 0.0  ;;  %v1471_v49 = vmul.f32 %v3377_v44, %v3377_v44  ;;  %vm1667_vm3 = vweird.f32 %v3384_v22  ;;  %v1664_v29 = vsub.f32 1.5, %v1663_v31 }
 0x1f0   : > { %v1366_v58 = vrot.slane %v1365_v54, 2  ;;  %v1255_v12 = vadd.f32 %v1254_v43, %v1253_v2  ;;  %v1699_v23 = vmul.f32 %v1683_v8, %v3335_v56  ;;  %v1747_v4 = vperm.slane %v1683_v8, 0  ;;  %vm1668_vm4 = vmor %vm1666_vm1, %vm1667_vm3 }
 0x1f1   : > { %v3406_v18 = vpop.f32.mrf.mxu1  ;;  %1943 = vmatmul.f32.gmra.mxu3 %v1869_v5  ;;  %v1476_v42 = vsub.f32 %v1444_v46, %v1460_v40  ;;  %v1487_v19 = vsub.f32 %v3381_v33, %v1471_v49  ;;  %v1250_v28 = vrot.slane %v1249_v63, 1  ;;  %v1665_v34 = vmul.f32 %v3384_v22, %v1664_v29 }
 0x1f2   : > { %v1258_v16 = vrot.slane %v3406_v18, 4  ;;  %v1319_v53 = vmul.f32 %v3406_v18, %v3406_v18  ;;  %v1367_v35 = vadd.f32 %v1366_v58, %v1365_v54  ;;  %v1715_v60 = vsub.f32 %v3281_v36, %v1699_v23 }
 0x1f3   : > { %v1492_v26 = vmax.f32 %v1476_v42, 0.0  ;;  %v1363_v61 = vadd.f32 %v1362_v37, %v1361_v15  ;;  %v1503_v56 = vmax.f32 %v1487_v19, 0.0  ;;  %v1779_v1 = vmul.f32 %v1747_v4, %v3292_v21 }
 0x1f4   : > { %v1259_v11 = vadd.f32 %v1258_v16, %v3406_v18  ;;  %v1370_v24 = vrot.slane %v1319_v53, 4  ;;  %v1811_v13 = vperm.slane %v1715_v60, 0  ;;  %v1669_v33 = vsel %vm1668_vm4, %v3384_v22, %v1665_v34 }
 0x1f5   : > { %v3427_v45 = vadd.f32 0.0001, %v1492_v26  ;;  %v1256_v10 = vrot.slane %v1255_v12, 1  ;;  %v1368_v14 = vrot.slane %v1367_v35, 1  ;;  %v1694_v30 = vmul.f32 %v1669_v33, %v3260_v7 }
 0x1f6   : > { %v1260_v52 = vrot.slane %v1259_v11, 2  ;;  %v1371_v27 = vadd.f32 %v1370_v24, %v1319_v53  ;;  %v1843_v51 = vadd.f32 %v1811_v13, %v1779_v1  ;;  %v3433_v57 = vadd.f32 0.0001, %v1503_v56 }
 0x1f7   : > { %2284 = vrsqrt.f32 %v3427_v45  ;;  %v1251_v3 = vadd.f32 %v1250_v28, %v1249_v63  ;;  %v1710_v32 = vmul.f32 %v1694_v30, %v3326_v41  ;;  %v1758_v17 = vperm.slane %v1694_v30, 0 }
 0x1f8   : > { %v1372_v25 = vrot.slane %v1371_v27, 2  ;;  %v1261_v48 = vadd.f32 %v1260_v52, %v1259_v11  ;;  %v1859_v20 = vmax.f32 %v1843_v51, 0.0  ;;  %2286 = vrsqrt.f32 %v3433_v57 }
 0x1f9   : > { %v3430_v2 = vpop.f32.mrf.mxu1  ;;  %v1369_v43 = vadd.f32 %v1368_v14, %v1367_v35  ;;  %v1445_v46 = vmul.f32 0.125, %v1363_v61  ;;  %v1726_v0 = vsub.f32 %v3281_v36, %v1710_v32  ;;  %v3442_v39 = vmul.f32 0.125, %v1251_v3 }
 0x1fa   : > { %v1373_v21 = vadd.f32 %v1372_v25, %v1371_v27  ;;  %v1264_v15 = vrot.slane %v3430_v2, 4  ;;  %v1320_v22 = vmul.f32 %v3430_v2, %v3430_v2  ;;  %1913 = vmatmul.f32.gmra.mxu2 %v1859_v20  ;;  %v1257_v63 = vadd.f32 %v1256_v10, %v1255_v12 }
 0x1fb   : > { %v1262_v58 = vrot.slane %v1261_v48, 1  ;;  %v1790_v31 = vmul.f32 %v1758_v17, %v3283_v62  ;;  %v1822_v5 = vperm.slane %v1726_v0, 0  ;;  %v1461_v40 = vmul.f32 %v3442_v39, %v3442_v39 }
 0x1fc   : > { %v1374_v54 = vrot.slane %v1373_v21, 1  ;;  %v1265_v9 = vadd.f32 %v1264_v15, %v3430_v2  ;;  %v1376_v38 = vrot.slane %v1320_v22, 4  ;;  %v3449_v49 = vmul.f32 0.125, %v1257_v63 }
 0x1fd   : > { %v3445_v41 = vpop.eup %2284  ;;  %v1446_v16 = vmul.f32 0.125, %v1369_v43  ;;  %v1854_v62 = vadd.f32 %v1822_v5, %v1790_v31  ;;  %vm1566_vm5 = vweird.f32 %v3427_v45  ;;  %v1477_v42 = vsub.f32 %v1445_v46, %v1461_v40 }
 0x1fe   : > { %v1377_v8 = vadd.f32 %v1376_v38, %v1320_v22  ;;  %v1375_v37 = vadd.f32 %v1374_v54, %v1373_v21  ;;  %v1266_v53 = vrot.slane %v1265_v9, 2  ;;  %v1561_v4 = vmul.f32 %v3445_v41, %v3427_v45  ;;  %v3453_v12 = vpop.eup %2286 }
 0x1ff   : > { %v1462_v35 = vmul.f32 %v3449_v49, %v3449_v49  ;;  %v1263_v28 = vadd.f32 %v1262_v58, %v1261_v48  ;;  %v1870_v34 = vmax.f32 %v1854_v62, 0.0  ;;  %v1671_v61 = vmul.f32 %v3453_v12, %v3433_v57 }
 0x200   : > { %v1378_v23 = vrot.slane %v1377_v8, 2  ;;  %v3463_v60 = vmul.f32 0.125, %v1375_v37  ;;  %v1562_v26 = vmul.f32 %v3445_v41, %v1561_v4  ;;  %vm1676_vm6 = vweird.f32 %v3433_v57 }
 0x201   : > { %v3455_v29 = vpop.f32.mrf.mxu1  ;;  %v1267_v52 = vadd.f32 %v1266_v53, %v1265_v9  ;;  %v1493_v1 = vmax.f32 %v1477_v42, 0.0  ;;  %1946 = vmatmul.f32.gmra.mxu3 %v1870_v34  ;;  %v1672_v10 = vmul.f32 %v3453_v12, %v1671_v61  ;;  %v1478_v14 = vsub.f32 %v1446_v16, %v1462_v35 }
 0x202   : > { %v1379_v11 = vadd.f32 %v1378_v23, %v1377_v8  ;;  %v1270_v24 = vrot.slane %v3455_v29, 4  ;;  %v1321_v19 = vmul.f32 %v3455_v29, %v3455_v29  ;;  %v1563_v33 = vmul.f32 0.5, %v1562_v26 }
 0x203   : > { %v3471_v51 = vadd.f32 0.0001, %v1493_v1  ;;  %v3473_v3 = vmul.f32 0.125, %v1263_v28  ;;  %vm1567_vm7 = vweird.f32 %v3445_v41  ;;  %v1673_v21 = vmul.f32 0.5, %v1672_v10 }
 0x204   : > { %v1271_v27 = vadd.f32 %v1270_v24, %v3455_v29  ;;  %v1382_v56 = vrot.slane %v1321_v19, 4  ;;  %v1380_v13 = vrot.slane %v1379_v11, 1  ;;  %v1564_v48 = vsub.f32 1.5, %v1563_v33  ;;  %vm1568_vm9 = vmor %vm1566_vm5, %vm1567_vm7 }
 0x205   : > { %v1494_v15 = vmax.f32 %v1478_v14, 0.0  ;;  %vm1677_vm8 = vweird.f32 %v3453_v12  ;;  %2288 = vrsqrt.f32 %v3471_v51  ;;  %v1674_v54 = vsub.f32 1.5, %v1673_v21 }
 0x206   : > { %v1272_v25 = vrot.slane %v1271_v27, 2  ;;  %v1383_v30 = vadd.f32 %v1382_v56, %v1321_v19  ;;  %v1381_v32 = vadd.f32 %v1380_v13, %v1379_v11  ;;  %v1565_v43 = vmul.f32 %v3445_v41, %v1564_v48  ;;  %vm1678_vm10 = vmor %vm1676_vm6, %vm1677_vm8 }
 0x207   : > { %v3481_v9 = vadd.f32 0.0001, %v1494_v15  ;;  %v1463_v63 = vmul.f32 %v3473_v3, %v3473_v3  ;;  %v1268_v58 = vrot.slane %v1267_v52, 1  ;;  %v1675_v31 = vmul.f32 %v3453_v12, %v1674_v54 }
 0x208   : > { %v1273_v22 = vadd.f32 %v1272_v25, %v1271_v27  ;;  %v1384_v20 = vrot.slane %v1383_v30, 2  ;;  %v1569_v8 = vsel %vm1568_vm9, %v3445_v41, %v1565_v43  ;;  %v3501_v45 = vmul.f32 0.125, %v1381_v32 }
 0x209   : > { %v3478_v17 = vpop.f32.mrf.mxu1  ;;  %2290 = vrsqrt.f32 %v3481_v9  ;;  %v1684_v16 = vmul.f32 %v1569_v8, %v3260_v7  ;;  %v1679_v41 = vsel %vm1678_vm10, %v3453_v12, %v1675_v31  ;;  %v1479_v35 = vsub.f32 %v3463_v60, %v1463_v63 }
 0x20a   : > { %v1385_v38 = vadd.f32 %v1384_v20, %v1383_v30  ;;  %v1276_v46 = vrot.slane %v3478_v17, 4  ;;  %v1322_v0 = vmul.f32 %v3478_v17, %v3478_v17  ;;  %v1274_v37 = vrot.slane %v1273_v22, 1 }
 0x20b   : > { %v2289_v23 = vpop.eup %2288  ;;  %v1700_v42 = vmul.f32 %v1684_v16, %v3403_v6  ;;  %v1748_v11 = vperm.slane %v1684_v16, 0  ;;  %v1695_v24 = vmul.f32 %v1679_v41, %v3260_v7  ;;  %vm1576_vm11 = vweird.f32 %v3471_v51 }
 0x20c   : > { %v1277_v5 = vadd.f32 %v1276_v46, %v3478_v17  ;;  %v1388_v40 = vrot.slane %v1322_v0, 4  ;;  %v1386_v53 = vrot.slane %v1385_v38, 1  ;;  %v1571_v19 = vmul.f32 %v2289_v23, %v3471_v51 }
 0x20d   : > { %v1269_v57 = vadd.f32 %v1268_v58, %v1267_v52  ;;  %v1716_v26 = vsub.f32 %v3281_v36, %v1700_v42  ;;  %v1275_v12 = vadd.f32 %v1274_v37, %v1273_v22  ;;  %v1711_v6 = vmul.f32 %v1695_v24, %v3377_v44 }
 0x20e   : > { %v1278_v4 = vrot.slane %v1277_v5, 2  ;;  %v1389_v62 = vadd.f32 %v1388_v40, %v1322_v0  ;;  %v1387_v27 = vadd.f32 %v1386_v53, %v1385_v38  ;;  %v1759_v60 = vperm.slane %v1695_v24, 0 }
 0x20f   : > { %v3510_v61 = vpop.eup %2290  ;;  %v1572_v1 = vmul.f32 %v2289_v23, %v1571_v19  ;;  %v1780_v33 = vmul.f32 %v1748_v11, %v3350_v59  ;;  %v1812_v10 = vperm.slane %v1716_v26, 0  ;;  %v1727_v25 = vsub.f32 %v3281_v36, %v1711_v6 }
 0x210   : > { %v1279_v28 = vadd.f32 %v1278_v4, %v1277_v5  ;;  %v1390_v34 = vrot.slane %v1389_v62, 2  ;;  %vm1577_vm12 = vweird.f32 %v2289_v23  ;;  %v1581_v44 = vmul.f32 %v3510_v61, %v3481_v9 }
 0x211   : > { %v3512_v56 = vpop.f32.mrf.mxu1  ;;  %v1573_v30 = vmul.f32 0.5, %v1572_v1  ;;  %v1844_v21 = vadd.f32 %v1812_v10, %v1780_v33  ;;  %vm1586_vm13 = vweird.f32 %v3481_v9  ;;  %v1791_v22 = vmul.f32 %v1759_v60, %v3337_v55  ;;  %vm1578_vm14 = vmor %vm1576_vm11, %vm1577_vm12 }
 0x212   : > { %v1391_v13 = vadd.f32 %v1390_v34, %v1389_v62  ;;  %v1282_v52 = vrot.slane %v3512_v56, 4  ;;  %v1323_v14 = vmul.f32 %v3512_v56, %v3512_v56  ;;  %v1280_v48 = vrot.slane %v1279_v28, 1 }
 0x213   : > { %v1823_v20 = vperm.slane %v1727_v25, 0  ;;  %v1574_v32 = vsub.f32 1.5, %v1573_v30  ;;  %v1860_v54 = vmax.f32 %v1844_v21, 0.0  ;;  %v1582_v46 = vmul.f32 %v3510_v61, %v1581_v44 }
 0x214   : > { %v1283_v15 = vadd.f32 %v1282_v52, %v3512_v56  ;;  %v1394_v59 = vrot.slane %v1323_v14, 4  ;;  %v1392_v43 = vrot.slane %v1391_v13, 1  ;;  %v1495_v8 = vmax.f32 %v1479_v35, 0.0 }
 0x215   : > { %v1855_v63 = vadd.f32 %v1823_v20, %v1791_v22  ;;  %v1575_v58 = vmul.f32 %v2289_v23, %v1574_v32  ;;  %1916 = vmatmul.f32.gmra.mxu2 %v1860_v54  ;;  %v1583_v37 = vmul.f32 0.5, %v1582_v46  ;;  %vm1587_vm15 = vweird.f32 %v3510_v61 }
 0x216   : > { %v1284_v38 = vrot.slane %v1283_v15, 2  ;;  %v1395_v0 = vadd.f32 %v1394_v59, %v1323_v14  ;;  %v3530_v55 = vmul.f32 0.125, %v1269_v57  ;;  %v3532_v53 = vadd.f32 0.0001, %v1495_v8  ;;  %vm1588_vm0 = vmor %vm1586_vm13, %vm1587_vm15 }
 0x217   : > { %v1871_v40 = vmax.f32 %v1855_v63, 0.0  ;;  %v1579_v16 = vsel %vm1578_vm14, %v2289_v23, %v1575_v58  ;;  %v1584_v62 = vsub.f32 1.5, %v1583_v37  ;;  %v1449_v35 = vmul.f32 0.125, %v1387_v27 }
 0x218   : > { %v1285_v31 = vadd.f32 %v1284_v38, %v1283_v15  ;;  %v1396_v5 = vrot.slane %v1395_v0, 2  ;;  %v1685_v4 = vmul.f32 %v1579_v16, %v3260_v7  ;;  %v1464_v42 = vmul.f32 %v3530_v55, %v3530_v55 }
 0x219   : > { %1949 = vmatmul.f32.gmra.mxu3 %v1871_v40  ;;  %2292 = vrsqrt.f32 %v3532_v53  ;;  %v3538_v11 = vmul.f32 0.125, %v1275_v12  ;;  %v1585_v57 = vmul.f32 %v3510_v61, %v1584_v62  ;;  %v1281_v6 = vadd.f32 %v1280_v48, %v1279_v28 }
 0x21a   : > { %v1286_v41 = vrot.slane %v1285_v31, 1  ;;  %v1397_v51 = vadd.f32 %v1396_v5, %v1395_v0  ;;  %v1701_v19 = vmul.f32 %v1685_v4, %v3442_v39  ;;  %v1749_v23 = vperm.slane %v1685_v4, 0 }
 0x21b   : > { %v1480_v26 = vsub.f32 %v3501_v45, %v1464_v42  ;;  %v1465_v27 = vmul.f32 %v3538_v11, %v3538_v11  ;;  %v1393_v12 = vadd.f32 %v1392_v43, %v1391_v13  ;;  %v1589_v1 = vsel %vm1588_vm0, %v3510_v61, %v1585_v57 }
 0x21c   : > { %v1287_v24 = vadd.f32 %v1286_v41, %v1285_v31  ;;  %v1398_v34 = vrot.slane %v1397_v51, 1  ;;  %v1717_v39 = vsub.f32 %v3281_v36, %v1701_v19  ;;  %v1686_v10 = vmul.f32 %v1589_v1, %v3260_v7 }
 0x21d   : > { %v1496_v52 = vmax.f32 %v1480_v26, 0.0  ;;  %v1481_v14 = vsub.f32 %v1449_v35, %v1465_v27  ;;  %v1781_v45 = vmul.f32 %v1749_v23, %v3364_v50  ;;  %v3557_v30 = vmul.f32 0.125, %v1281_v6 }
 0x21e   : > { %v3549_v60 = vmul.f32 0.125, %v1287_v24  ;;  %v1399_v33 = vadd.f32 %v1398_v34, %v1397_v51  ;;  %v1813_v25 = vperm.slane %v1717_v39, 0  ;;  %v1702_v48 = vmul.f32 %v1686_v10, %v3449_v49 }
 0x21f   : > { %v2293_v28 = vpop.eup %2292  ;;  %v1750_v21 = vperm.slane %v1686_v10, 0  ;;  %v1512_v15 = vadd.f32 0.0001, %v1496_v52  ;;  %v1497_v59 = vmax.f32 %v1481_v14, 0.0  ;;  %v1450_v22 = vmul.f32 0.125, %v1393_v12 }
 0x220   : > { %v1467_v9 = vmul.f32 %v3549_v60, %v3549_v60  ;;  %v1451_v13 = vmul.f32 0.125, %v1399_v33  ;;  %v1845_v61 = vadd.f32 %v1813_v25, %v1781_v45  ;;  %v1591_v44 = vmul.f32 %v2293_v28, %v3532_v53  ;;  %v2302_v25 = vld [vmem:[%s3649_s5] sm:$0x1] }
 0x221   : > { %v1718_v32 = vsub.f32 %v3281_v36, %v1702_v48  ;;  %2294 = vrsqrt.f32 %v1512_v15  ;;  %v1513_v54 = vadd.f32 0.0001, %v1497_v59  ;;  %v1782_v46 = vmul.f32 %v1750_v21, %v3386_v47 }
 0x222   : > { %v1483_v20 = vsub.f32 %v1451_v13, %v1467_v9  ;;  %v1861_v43 = vmax.f32 %v1845_v61, 0.0  ;;  %v1592_v50 = vmul.f32 %v2293_v28, %v1591_v44  ;;  %v1466_v49 = vmul.f32 %v3557_v30, %v3557_v30 }
 0x223   : > { %v1814_v0 = vperm.slane %v1718_v32, 0  ;;  %2296 = vrsqrt.f32 %v1513_v54  ;;  %vm1597_vm1 = vweird.f32 %v2293_v28  ;;  %vm1596_vm2 = vweird.f32 %v3532_v53 }
 0x224   : > { %v1499_v38 = vmax.f32 %v1483_v20, 0.0  ;;  %1919 = vmatmul.f32.gmra.mxu2 %v1861_v43  ;;  %v1593_v63 = vmul.f32 0.5, %v1592_v50  ;;  %v1482_v31 = vsub.f32 %v1450_v22, %v1466_v49  ;;  %vm1598_vm3 = vmor %vm1596_vm2, %vm1597_vm1  ;;  %vm1606_vm5 = vweird.f32 %v1512_v15 }
 0x225   : > { %v1846_v8 = vadd.f32 %v1814_v0, %v1782_v46  ;;  %vm1616_vm8 = vweird.f32 %v1513_v54 }
 0x226   : > { %v3565_v58 = vadd.f32 0.0001, %v1499_v38  ;;  %v1594_v37 = vsub.f32 1.5, %v1593_v63  ;;  %v1498_v40 = vmax.f32 %v1482_v31, 0.0 }
 0x227   : > { %v2295_v5 = vpop.eup %2294  ;;  %v1862_v16 = vmax.f32 %v1846_v8, 0.0 }
 0x228   : > { %2298 = vrsqrt.f32 %v3565_v58  ;;  %v1595_v41 = vmul.f32 %v2293_v28, %v1594_v37  ;;  %v1601_v47 = vmul.f32 %v2295_v5, %v1512_v15  ;;  %v1514_v4 = vadd.f32 0.0001, %v1498_v40 }
 0x229   : > { %v2297_v62 = vpop.eup %2296  ;;  %vm1607_vm4 = vweird.f32 %v2295_v5  ;;  %vm1636_vm12 = vweird.f32 %v3565_v58 }
 0x22a   : > { %v1599_v42 = vsel %vm1598_vm3, %v2293_v28, %v1595_v41  ;;  %v1602_v35 = vmul.f32 %v2295_v5, %v1601_v47  ;;  %v1611_v24 = vmul.f32 %v2297_v62, %v1513_v54  ;;  %2300 = vrsqrt.f32 %v1514_v4  ;;  %vm1608_vm6 = vmor %vm1606_vm5, %vm1607_vm4 }
 0x22b   : > { %v1687_v51 = vmul.f32 %v1599_v42, %v3260_v7  ;;  %vm1617_vm7 = vweird.f32 %v2297_v62  ;;  %vm1626_vm14 = vweird.f32 %v1514_v4 }
 0x22c   : > { %1922 = vmatmul.f32.gmra.mxu2 %v1862_v16  ;;  %v1603_v19 = vmul.f32 0.5, %v1602_v35  ;;  %v1612_v26 = vmul.f32 %v2297_v62, %v1611_v24  ;;  %vm1618_vm9 = vmor %vm1616_vm8, %vm1617_vm7 }
 0x22d   : > { %v1703_v57 = vmul.f32 %v1687_v51, %v3473_v3  ;;  %v1751_v34 = vperm.slane %v1687_v51, 0 }
 0x22e   : > { %v2299_v23 = vpop.eup %2298  ;;  %v1604_v53 = vsub.f32 1.5, %v1603_v19  ;;  %v1613_v12 = vmul.f32 0.5, %v1612_v26 }
 0x22f   : > { %v1631_v27 = vmul.f32 %v2299_v23, %v3565_v58  ;;  %v1719_v6 = vsub.f32 %v3281_v36, %v1703_v57  ;;  %v1783_v33 = vmul.f32 %v1751_v34, %v3406_v18  ;;  %vm1637_vm10 = vweird.f32 %v2299_v23 }
 0x230   : > { %v1605_v1 = vmul.f32 %v2295_v5, %v1604_v53  ;;  %v2301_v7 = vpop.eup %2300  ;;  %v1614_v52 = vsub.f32 1.5, %v1613_v12  ;;  %vm1638_vm13 = vmor %vm1636_vm12, %vm1637_vm10 }
 0x231   : > { %v1632_v39 = vmul.f32 %v2299_v23, %v1631_v27  ;;  %v1815_v10 = vperm.slane %v1719_v6, 0  ;;  %v1621_v9 = vmul.f32 %v2301_v7, %v1514_v4  ;;  %vm1627_vm11 = vweird.f32 %v2301_v7 }
 0x232   : > { %v1609_v14 = vsel %vm1608_vm6, %v2295_v5, %v1605_v1  ;;  %v1615_v13 = vmul.f32 %v2297_v62, %v1614_v52  ;;  %vm1628_vm15 = vmor %vm1626_vm14, %vm1627_vm11 }
 0x233   : > { %v1633_v3 = vmul.f32 0.5, %v1632_v39  ;;  %v1847_v45 = vadd.f32 %v1815_v10, %v1783_v33  ;;  %v1688_v28 = vmul.f32 %v2302_v25, %v1609_v14  ;;  %v1622_v21 = vmul.f32 %v2301_v7, %v1621_v9 }
 0x234   : > { %v1619_v44 = vsel %vm1618_vm9, %v2297_v62, %v1615_v13 }
 0x235   : > { %v1634_v48 = vsub.f32 1.5, %v1633_v3  ;;  %v1863_v15 = vmax.f32 %v1847_v45, 0.0  ;;  %v1704_v18 = vmul.f32 %v1688_v28, %v3530_v55  ;;  %v1752_v61 = vperm.slane %v1688_v28, 0  ;;  %v2303_v55 = vld [vmem:[%s3650_s6] sm:$0x1] }
 0x236   : > { %v1689_v59 = vmul.f32 %v2302_v25, %v1619_v44  ;;  %v1623_v22 = vmul.f32 0.5, %v1622_v21 }
 0x237   : > { %1925 = vmatmul.f32.gmra.mxu2 %v1863_v15  ;;  %v1720_v20 = vsub.f32 %v3281_v36, %v1704_v18  ;;  %v1635_v32 = vmul.f32 %v2299_v23, %v1634_v48  ;;  %v1784_v54 = vmul.f32 %v1752_v61, %v3430_v2 }
 0x238   : > { %v1705_v43 = vmul.f32 %v1689_v59, %v3538_v11  ;;  %v1624_v50 = vsub.f32 1.5, %v1623_v22  ;;  %v1753_v46 = vperm.slane %v1689_v59, 0 }
 0x239   : > { %v1816_v38 = vperm.slane %v1720_v20, 0  ;;  %v1639_v63 = vsel %vm1638_vm13, %v2299_v23, %v1635_v32 }
 0x23a   : > { %v1721_v0 = vsub.f32 %v2303_v55, %v1705_v43  ;;  %v1625_v49 = vmul.f32 %v2301_v7, %v1624_v50  ;;  %v1785_v58 = vmul.f32 %v1753_v46, %v3455_v29  ;;  %v1691_v2 = vmul.f32 %v2302_v25, %v1639_v63 }
 0x23b   : > { %v1848_v36 = vadd.f32 %v1816_v38, %v1784_v54 }
 0x23c   : > { %v1817_v11 = vperm.slane %v1721_v0, 0  ;;  %v1629_v8 = vsel %vm1628_vm15, %v2301_v7, %v1625_v49  ;;  %v1707_v4 = vmul.f32 %v1691_v2, %v3549_v60  ;;  %v1755_v24 = vperm.slane %v1691_v2, 0 }
 0x23d   : > { %v1864_v31 = vmax.f32 %v1848_v36, 0.0  ;;  %v1690_v37 = vmul.f32 %v2302_v25, %v1629_v8 }
 0x23e   : > { %v1849_v5 = vadd.f32 %v1817_v11, %v1785_v58  ;;  %v1723_v51 = vsub.f32 %v2303_v55, %v1707_v4  ;;  %v1787_v23 = vmul.f32 %v1755_v24, %v3512_v56 }
 0x23f   : > { %1928 = vmatmul.f32.gmra.mxu2 %v1864_v31  ;;  %v1706_v40 = vmul.f32 %v1690_v37, %v3557_v30  ;;  %v1754_v41 = vperm.slane %v1690_v37, 0 }
 0x240   : > { %v1865_v47 = vmax.f32 %v1849_v5, 0.0  ;;  %v1819_v19 = vperm.slane %v1723_v51, 0 }
 0x241   : > { %v1722_v16 = vsub.f32 %v2303_v55, %v1706_v40  ;;  %v1786_v42 = vmul.f32 %v1754_v41, %v3478_v17 }
 0x242   : > { %v1851_v57 = vadd.f32 %v1819_v19, %v1787_v23 }
 0x243   : > { %v1818_v62 = vperm.slane %v1722_v16, 0 }
 0x244   : > { %v1867_v17 = vmax.f32 %v1851_v57, 0.0 }
 0x245   : > { %v1850_v35 = vadd.f32 %v1818_v62, %v1786_v42 }
 0x247   : > { %1931 = vmatmul.f32.gmra.mxu2 %v1865_v47  ;;  %v1866_v29 = vmax.f32 %v1850_v35, 0.0 }
 0x24f   : > { %1934 = vmatmul.f32.gmra.mxu2 %v1866_v29 }
 0x250   : > { %v1905_v30 = vpop.f32.mrf.mxu2 }
 0x251   : > { %1953 = vst [vmem:[%s3592_s13] sm:$0xff] %v1905_v30 }
 0x257   : > { %1937 = vmatmul.f32.gmra.mxu2 %v1867_v17  ;;  %v1941_v56 = vpop.f32.mrf.mxu3 }
 0x258   : > { %1965 = vst [vmem:[%s3592_s13 + $0x60] sm:$0xff] %v1941_v56 }
 0x25c   : > { %v1908_v60 = vpop.f32.mrf.mxu2 }
 0x25d   : > { %1954 = vst [vmem:[%s3592_s13 + $0x8] sm:$0xff] %v1908_v60 }
 0x271   : > { %v1911_v34 = vpop.f32.mrf.mxu2 }
 0x272   : > { %1955 = vst [vmem:[%s3592_s13 + $0x10] sm:$0xff] %v1911_v34 }
 0x274   : > { %v1944_v26 = vpop.f32.mrf.mxu3 }
 0x275   : > { %1966 = vst [vmem:[%s3592_s13 + $0x68] sm:$0xff] %v1944_v26 }
 0x27d   : > { %v1914_v27 = vpop.f32.mrf.mxu2 }
 0x27e   : > { %1956 = vst [vmem:[%s3592_s13 + $0x18] sm:$0xff] %v1914_v27 }
 0x284   : > { %v1947_v53 = vpop.f32.mrf.mxu3 }
 0x285   : > { %1967 = vst [vmem:[%s3592_s13 + $0x70] sm:$0xff] %v1947_v53 }
 0x298   : > { %v1917_v6 = vpop.f32.mrf.mxu2 }
 0x299   : > { %1957 = vst [vmem:[%s3592_s13 + $0x20] sm:$0xff] %v1917_v6 }
 0x29c   : > { %v1950_v12 = vpop.f32.mrf.mxu3 }
 0x29d   : > { %1968 = vst [vmem:[%s3592_s13 + $0x78] sm:$0xff] %v1950_v12 }
 0x2a7   : > { %v1920_v39 = vpop.f32.mrf.mxu2 }
 0x2a8   : > { %1958 = vst [vmem:[%s3592_s13 + $0x28] sm:$0xff] %v1920_v39 }
 0x2af   : > { %v1923_v1 = vpop.f32.mrf.mxu2 }
 0x2b0   : > { %1959 = vst [vmem:[%s3592_s13 + $0x30] sm:$0xff] %v1923_v1 }
 0x2ba   : > { %v1926_v7 = vpop.f32.mrf.mxu2 }
 0x2bb   : > { %1960 = vst [vmem:[%s3592_s13 + $0x38] sm:$0xff] %v1926_v7 }
 0x2c2   : > { %v1929_v33 = vpop.f32.mrf.mxu2 }
 0x2c3   : > { %1961 = vst [vmem:[%s3592_s13 + $0x40] sm:$0xff] %v1929_v33 }
 0x2ca   : > { %v1932_v10 = vpop.f32.mrf.mxu2 }
 0x2cb   : > { %1962 = vst [vmem:[%s3592_s13 + $0x48] sm:$0xff] %v1932_v10 }
 0x2d2   : > { %v1935_v52 = vpop.f32.mrf.mxu2 }
 0x2d3   : > { %1963 = vst [vmem:[%s3592_s13 + $0x50] sm:$0xff] %v1935_v52 }
 0x2da   : > { %v1938_v3 = vpop.f32.mrf.mxu2 }
 0x2db   : > { %1964 = vst [vmem:[%s3592_s13 + $0x58] sm:$0xff] %v1938_v3 }
 0x2dc   : > { %2451 = shalt.err (!%p2448_p10)
}
 0x2dd   : > { %s2505_s19 = smov 128   ;;  %s2506_s13 = smov 8  }
 0x2de   : > { %2171 = dma.vmem_to_hbm [thread:$0]  (%p2643_p3), %s1983_s24, 2048, %s1985_s17, %s1970_s21, %s2505_s19, %s2505_s19, %s2506_s13  }
 0x2df PF: > { %s1999_s1 = sand.u32 1, %s2486_s27   ;;  %p3675_p12 = scmp.ge.s32.totalorder %s2498_s30, 2 }
 0x2e0   : > { %s2000_s11 = scalar_lea.sflag [#allocation4], %s1999_s1 }
 0x2e1   : > { %p2188_p13 = pnand %p3675_p12, %p2587_p6 }
 0x2e3   : > { %p2189_p0 = pneg %p2188_p13 }
 0x2e5   : > { %2481 = dma.done.wait (%p2189_p0), %s2000_s11, 2048  }
 0x2e6   : > { %2483 = vsyncadd (%p2189_p0), %s2000_s11, 4294965248  ;;  %p23_p5 = scmp.ge.s32.totalorder %s2625_s18, 4   ;;  %s3676_s27 = smov %s2490_s28 }
 0x2e7   : > { %s3677_s28 = smov %s2494_s29  ;;  %s3678_s29 = smov %s2639_s25 }
 0x2e8   : > { %s3679_s30 = smov %s2625_s18  ;;  %25 = sbr.rel (!%p23_p5) target bundleno = 10 (0xa), region = 109 }
 0x2ed   :  { %2006 = vsyncpa [#allocation3], 1 }
 0x2ee   :  { %2008 = vsyncpa [#allocation3 + $0x1], 1 }
 0x2ef   :  { %2009 = vsyncpa [#allocation6], 1 }
 0x2f0   :  { %2010 = vsyncpa [#allocation9], 1 }
 0x2f1   :  { %2011 = vsyncpa [#allocation4], 1 }
 0x2f2   :  { %2013 = vsyncpa [#allocation4 + $0x1], 1 }

</bundles_post_ra>
